<compile_context>
chip_gen: v5e
topology: v5e:2x2
jax: 0.10.0
libtpu: 0.0.40
codegen_flags: <defaults>
</compile_context>

<pallas_src>
import functools

import jax
import jax.numpy as jnp
import numpy as np
from jax import lax
from jax.experimental import pallas as pl
from jax.experimental.pallas import tpu as pltpu


# -----------------------------------------------------------------------------
# Fused kernel: conv(as matmul) + max-pool + ReLU + fc1 + fc2 + fc3
#   x_ref   : (nb, 196)      bf16 raw pixels (ih*14+iw flatten)
#   wc_ref  : (4, 196, 256)  bf16 conv-as-matmul weight, one slab per pool offset
#   bc_ref  : (1, 256)       f32 conv bias broadcast over (c,h,w) features
#   w1_ref  : (256, 128)     bf16 fc1 weight, zero-padded (150x120 real)
#   w2_ref  : (128, 128)     bf16 fc2 weight, zero-padded (120x84 real)
#   w3c_ref : (128, 1)       f32 fc3 weight column, zero-padded (84 real)
#   b3_ref  : (1, 128)       f32 fc3 bias broadcast across lanes
#   o_ref   : (1, nb//128, 128) f32 lane-packed output: sample g*128+b -> [0,g,b]
# -----------------------------------------------------------------------------
def net_fused_kernel(x_ref, wc_ref, bc_ref, w1_ref, b1_ref,
                     w2_ref, b2_ref, w3c_ref, b3_ref, o_ref):
    x = x_ref[...]                                                   # (nb,196) bf16

    # Conv evaluated at the 4 positions of every 2x2 pool window: one 256-wide
    # MXU dot per offset, folded with max (keeps the live intermediate small).
    pooled = jnp.dot(x, wc_ref[0], preferred_element_type=jnp.float32)
    for q in range(1, 4):
        pooled = jnp.maximum(
            pooled, jnp.dot(x, wc_ref[q], preferred_element_type=jnp.float32))
    # + bias, ReLU  (bias identical across offsets, ReLU monotone => order OK)
    feat = jnp.maximum(pooled + bc_ref[...], 0.0)                    # (nb,256) f32

    h = jnp.dot(feat.astype(jnp.bfloat16), w1_ref[...],
                preferred_element_type=jnp.float32) + b1_ref[...]
    h = jnp.maximum(h, 0.0)
    h = jnp.dot(h.astype(jnp.bfloat16), w2_ref[...],
                preferred_element_type=jnp.float32) + b2_ref[...]
    h = jnp.maximum(h, 0.0)                                          # (nb,128) f32

    # fc3 -> one scalar per sample, emitted lane-packed.  For each 128-row
    # group: transpose on the XLU, multiply by the fc3 weight column, reduce
    # over sublanes -> a lane-dense (1,128) row of per-sample scalars.
    w3c = w3c_ref[...]                                               # (128,1) f32
    b3r = b3_ref[...]                                                # (1,128) f32
    ng = o_ref.shape[1]
    for g in range(ng):
        hgT = h[g * 128:(g + 1) * 128, :].T                          # (128,128)
        vals = jnp.sum(hgT * w3c, axis=0, keepdims=True) + b3r       # (1,128)
        o_ref[0, g:g + 1, :] = vals


# -----------------------------------------------------------------------------
# One-time parameter repack (numpy, outside the traced forward).
# -----------------------------------------------------------------------------
def prepare_params(params):
    wc, bc, w1, b1, w2, b2, w3, b3 = (np.asarray(p, dtype=np.float32) for p in params)

    # Conv(1->6, 5x5) on a 14x14 input, evaluated at the 4 positions of every
    # 2x2 pool window, as 4 matmul weights of shape (196, 256).
    # Column index = c*25 + ph*5 + pw (cols [150,256) zero) so the
    # max-over-offsets result matches PyTorch's x.view(-1, 6*5*5) layout.
    Wc = np.zeros((4, 196, 256), dtype=np.float32)
    ph = np.arange(5)[:, None]
    pw = np.arange(5)[None, :]
    col = (ph * 5 + pw).ravel()                                      # (25,)
    for dh in range(2):
        for dw in range(2):
            q = dh * 2 + dw
            oh = 2 * ph + dh
            ow = 2 * pw + dw
            for kh in range(5):
                for kw in range(5):
                    pix = ((oh + kh) * 14 + (ow + kw)).ravel()       # (25,)
                    for c in range(6):
                        Wc[q, pix, c * 25 + col] = wc[c, 0, kh, kw]

    bc_big = np.zeros((1, 256), dtype=np.float32)
    bc_big[0, :150] = np.repeat(bc, 25)

    W1p = np.zeros((256, 128), dtype=np.float32); W1p[:150, :120] = w1.T
    b1p = np.zeros((1, 128), dtype=np.float32);   b1p[0, :120] = b1
    W2p = np.zeros((128, 128), dtype=np.float32); W2p[:120, :84] = w2.T
    b2p = np.zeros((1, 128), dtype=np.float32);   b2p[0, :84] = b2
    W3c = np.zeros((128, 1), dtype=np.float32);   W3c[:84, 0] = w3[0, :]
    b3r = np.full((1, 128), b3[0], dtype=np.float32)

    bf16 = lambda a: jnp.asarray(a, dtype=jnp.bfloat16)
    f32 = lambda a: jnp.asarray(a, dtype=jnp.float32)
    return (bf16(Wc), f32(bc_big), bf16(W1p), f32(b1p),
            bf16(W2p), f32(b2p), f32(W3c), f32(b3r))


def _round_up(v, m):
    return -(-v // m) * m


# -----------------------------------------------------------------------------
# Forward: (N, 1, 14, 14) -> (N, 1)
# -----------------------------------------------------------------------------
def net_forward(x, packed, block_n=1024):
    if x.ndim != 4 or tuple(x.shape[1:]) != (1, 14, 14):
        raise ValueError(f"Net expects (N, 1, 14, 14) inputs, got {x.shape}")
    N = x.shape[0]

    # --- batch-tile selection (nb must be a multiple of 128 for packed output)
    n128 = _round_up(N, 128)
    if n128 <= 256:
        nb = n128                      # tiny batch: a single step
    else:
        # big tiles (cap block_n) but >=2 grid steps so v7x megacore splits the
        # batch; >=256 rows keeps the 256-row MXU full on v6e/v7x.
        nb = min(block_n, max(256, _round_up(n128 // 2, 128)))
    n_steps = _round_up(N, nb) // nb
    n_pad = n_steps * nb

    # reshape + bf16 cast; the tail pad fuses into the same elementwise
    # materialization as the cast (no extra HBM pass) and keeps every grid
    # block fully in-bounds.
    x2 = x.reshape(N, 196).astype(jnp.bfloat16)
    if n_pad != N:
        x2 = jnp.pad(x2, ((0, n_pad - N), (0, 0)))

    Wc, bcb, W1p, b1p, W2p, b2p, W3c, b3r = packed
    const = lambda shape: pl.BlockSpec(shape, lambda i: (0,) * len(shape))

    out = pl.pallas_call(
        net_fused_kernel,
        out_shape=jax.ShapeDtypeStruct((n_steps, nb // 128, 128), jnp.float32),
        grid=(n_steps,),
        in_specs=[
            pl.BlockSpec((nb, 196), lambda i: (i, 0)),      # pixels (bf16)
            const((4, 196, 256)),                           # conv weights / pool offset
            const((1, 256)),                                # conv bias
            const((256, 128)), const((1, 128)),             # fc1
            const((128, 128)), const((1, 128)),             # fc2
            const((128, 1)), const((1, 128)),               # fc3 column + bias
        ],
        out_specs=pl.BlockSpec((1, nb // 128, 128), lambda i: (i, 0, 0)),
        compiler_params=pltpu.CompilerParams(
            dimension_semantics=("parallel",),
            vmem_limit_bytes=32 * 1024 * 1024),
    )(x2, Wc, bcb, W1p, b1p, W2p, b2p, W3c, b3r)

    # lane-packed (n_steps, nb//128, 128): flatten order == sample order
    return out.reshape(n_pad)[:N].reshape(N, 1)


# -----------------------------------------------------------------------------
# Init + pure-JAX reference (for verification)
# -----------------------------------------------------------------------------
def init_params(key):
    """PyTorch-default-style uniform(-1/sqrt(fan_in), 1/sqrt(fan_in)) init."""
    ks = jax.random.split(key, 8)

    def u(k, shape, fan_in):
        bound = 1.0 / np.sqrt(fan_in)
        return jax.random.uniform(k, shape, jnp.float32, -bound, bound)

    wc = u(ks[0], (6, 1, 5, 5), 25)      # conv1.weight
    bc = u(ks[1], (6,), 25)              # conv1.bias
    w1 = u(ks[2], (120, 150), 150)       # fc1.weight (out, in)
    b1 = u(ks[3], (120,), 150)
    w2 = u(ks[4], (84, 120), 120)        # fc2.weight
    b2 = u(ks[5], (84,), 120)
    w3 = u(ks[6], (1, 84), 84)           # fc3.weight
    b3 = u(ks[7], (1,), 84)
    return (wc, bc, w1, b1, w2, b2, w3, b3)


def reference_forward(x, params):
    wc, bc, w1, b1, w2, b2, w3, b3 = params
    y = lax.conv_general_dilated(
        x, wc, window_strides=(1, 1), padding="VALID",
        dimension_numbers=("NCHW", "OIHW", "NCHW"))
    y = jnp.maximum(y + bc.reshape(1, 6, 1, 1), 0.0)            # (N, 6, 10, 10)
    y = lax.reduce_window(y, -jnp.inf, lax.max,
                          (1, 1, 2, 2), (1, 1, 2, 2), "VALID")  # (N, 6, 5, 5)
    f = y.reshape(y.shape[0], 6 * 5 * 5)
    f = jnp.maximum(f @ w1.T + b1, 0.0)
    f = jnp.maximum(f @ w2.T + b2, 0.0)
    return f @ w3.T + b3


if __name__ == "__main__":
    key = jax.random.PRNGKey(0)
    k_param, k_x = jax.random.split(key)

    params = init_params(k_param)
    packed = prepare_params(params)     # one-time repack, outside traced fn

    fwd = jax.jit(functools.partial(net_forward, packed=packed))

    # input spatial must be 14x14 so conv(5)->10x10, pool(2)->5x5 => 6*5*5 feats
    x = jax.random.normal(k_x, (2, 1, 14, 14), dtype=jnp.float32)
    out = jax.block_until_ready(fwd(x))
    ref = reference_forward(x, params)
    assert out.shape == (2, 1), out.shape
    # bf16 matmuls with f32 accumulation -> relaxed tolerance vs f32 reference
    np.testing.assert_allclose(np.asarray(out), np.asarray(ref), rtol=5e-2, atol=5e-2)

    # ragged larger batch: exercises multi-step grid + multi-group output packing
    x_big = jax.random.normal(jax.random.PRNGKey(1), (300, 1, 14, 14), dtype=jnp.float32)
    out_big = jax.block_until_ready(fwd(x_big))
    ref_big = reference_forward(x_big, params)
    assert out_big.shape == (300, 1), out_big.shape
    np.testing.assert_allclose(np.asarray(out_big), np.asarray(ref_big), rtol=5e-2, atol=5e-2)

    print("KERNEL_OK")
</pallas_src>

<mosaic_0001>
module attributes {stable_mosaic.version = 11 : i64} {
  func.func @net_fused_kernel(%arg0: i32, %arg1: memref<128x196xbf16, #tpu.memory_space<vmem>>, %arg2: memref<4x196x256xbf16, #tpu.memory_space<vmem>>, %arg3: memref<1x256xf32, #tpu.memory_space<vmem>>, %arg4: memref<256x128xbf16, #tpu.memory_space<vmem>>, %arg5: memref<1x128xf32, #tpu.memory_space<vmem>>, %arg6: memref<128x128xbf16, #tpu.memory_space<vmem>>, %arg7: memref<1x128xf32, #tpu.memory_space<vmem>>, %arg8: memref<128x1xf32, #tpu.memory_space<vmem>>, %arg9: memref<1x128xf32, #tpu.memory_space<vmem>>, %arg10: memref<1x1x128xf32, #tpu.memory_space<vmem>>) attributes {dimension_semantics = [#tpu.dimension_semantics<parallel>], iteration_bounds = array<i64: 1>, scalar_prefetch = 0 : i64, scratch_operands = 0 : i64, tpu.core_type = #tpu.core_type<tc>, window_params = [{transform_indices = @transform_0, window_bounds = array<i64: 128, 196>}, {pipeline_mode = #tpu.pipeline_mode<synchronous>, transform_indices = @transform_1, window_bounds = array<i64: 4, 196, 256>}, {pipeline_mode = #tpu.pipeline_mode<synchronous>, transform_indices = @transform_2, window_bounds = array<i64: 1, 256>}, {pipeline_mode = #tpu.pipeline_mode<synchronous>, transform_indices = @transform_3, window_bounds = array<i64: 256, 128>}, {pipeline_mode = #tpu.pipeline_mode<synchronous>, transform_indices = @transform_4, window_bounds = array<i64: 1, 128>}, {pipeline_mode = #tpu.pipeline_mode<synchronous>, transform_indices = @transform_5, window_bounds = array<i64: 128, 128>}, {pipeline_mode = #tpu.pipeline_mode<synchronous>, transform_indices = @transform_6, window_bounds = array<i64: 1, 128>}, {pipeline_mode = #tpu.pipeline_mode<synchronous>, transform_indices = @transform_7, window_bounds = array<i64: 128, 1>}, {pipeline_mode = #tpu.pipeline_mode<synchronous>, transform_indices = @transform_8, window_bounds = array<i64: 1, 128>}, {transform_indices = @transform_9, window_bounds = array<i64: 1, 1, 128>}]} {
    %c0 = arith.constant 0 : index
    %c0_0 = arith.constant 0 : index
    %0 = vector.load %arg1[%c0, %c0_0] : memref<128x196xbf16, #tpu.memory_space<vmem>>, vector<128x196xbf16>
    %c0_1 = arith.constant 0 : index
    %c0_2 = arith.constant 0 : index
    %c0_3 = arith.constant 0 : index
    %1 = vector.load %arg2[%c0_1, %c0_2, %c0_3] : memref<4x196x256xbf16, #tpu.memory_space<vmem>>, vector<1x196x256xbf16>
    %2 = vector.shape_cast %1 : vector<1x196x256xbf16> to vector<196x256xbf16>
    %cst = arith.constant dense<0.000000e+00> : vector<128x256xf32>
    %3 = tpu.matmul %0, %2, %cst {dimension_numbers = #tpu.dot_dimension_numbers<[1], [0], [0], [1], [0, 0, 1, 1], [], []>} : vector<128x196xbf16>, vector<196x256xbf16>, vector<128x256xf32> -> vector<128x256xf32>
    %c1 = arith.constant 1 : index
    %c0_4 = arith.constant 0 : index
    %c0_5 = arith.constant 0 : index
    %4 = vector.load %arg2[%c1, %c0_4, %c0_5] : memref<4x196x256xbf16, #tpu.memory_space<vmem>>, vector<1x196x256xbf16>
    %5 = vector.shape_cast %4 : vector<1x196x256xbf16> to vector<196x256xbf16>
    %cst_6 = arith.constant dense<0.000000e+00> : vector<128x256xf32>
    %6 = tpu.matmul %0, %5, %cst_6 {dimension_numbers = #tpu.dot_dimension_numbers<[1], [0], [0], [1], [0, 0, 1, 1], [], []>} : vector<128x196xbf16>, vector<196x256xbf16>, vector<128x256xf32> -> vector<128x256xf32>
    %7 = arith.maximumf %3, %6 : vector<128x256xf32>
    %c2 = arith.constant 2 : index
    %c0_7 = arith.constant 0 : index
    %c0_8 = arith.constant 0 : index
    %8 = vector.load %arg2[%c2, %c0_7, %c0_8] : memref<4x196x256xbf16, #tpu.memory_space<vmem>>, vector<1x196x256xbf16>
    %9 = vector.shape_cast %8 : vector<1x196x256xbf16> to vector<196x256xbf16>
    %cst_9 = arith.constant dense<0.000000e+00> : vector<128x256xf32>
    %10 = tpu.matmul %0, %9, %cst_9 {dimension_numbers = #tpu.dot_dimension_numbers<[1], [0], [0], [1], [0, 0, 1, 1], [], []>} : vector<128x196xbf16>, vector<196x256xbf16>, vector<128x256xf32> -> vector<128x256xf32>
    %11 = arith.maximumf %7, %10 : vector<128x256xf32>
    %c3 = arith.constant 3 : index
    %c0_10 = arith.constant 0 : index
    %c0_11 = arith.constant 0 : index
    %12 = vector.load %arg2[%c3, %c0_10, %c0_11] : memref<4x196x256xbf16, #tpu.memory_space<vmem>>, vector<1x196x256xbf16>
    %13 = vector.shape_cast %12 : vector<1x196x256xbf16> to vector<196x256xbf16>
    %cst_12 = arith.constant dense<0.000000e+00> : vector<128x256xf32>
    %14 = tpu.matmul %0, %13, %cst_12 {dimension_numbers = #tpu.dot_dimension_numbers<[1], [0], [0], [1], [0, 0, 1, 1], [], []>} : vector<128x196xbf16>, vector<196x256xbf16>, vector<128x256xf32> -> vector<128x256xf32>
    %15 = arith.maximumf %11, %14 : vector<128x256xf32>
    %c0_13 = arith.constant 0 : index
    %c0_14 = arith.constant 0 : index
    %16 = vector.load %arg3[%c0_13, %c0_14] : memref<1x256xf32, #tpu.memory_space<vmem>>, vector<1x256xf32>
    %17 = vector.broadcast %16 : vector<1x256xf32> to vector<128x256xf32>
    %18 = arith.addf %15, %17 : vector<128x256xf32>
    %cst_15 = arith.constant 0.000000e+00 : f32
    %19 = vector.broadcast %cst_15 : f32 to vector<128x256xf32>
    %20 = arith.maximumf %18, %19 : vector<128x256xf32>
    %21 = arith.truncf %20 : vector<128x256xf32> to vector<128x256xbf16>
    %c0_16 = arith.constant 0 : index
    %c0_17 = arith.constant 0 : index
    %22 = vector.load %arg4[%c0_16, %c0_17] : memref<256x128xbf16, #tpu.memory_space<vmem>>, vector<256x128xbf16>
    %cst_18 = arith.constant dense<0.000000e+00> : vector<128x128xf32>
    %23 = tpu.matmul %21, %22, %cst_18 {dimension_numbers = #tpu.dot_dimension_numbers<[1], [0], [0], [1], [0, 0, 1, 1], [], []>} : vector<128x256xbf16>, vector<256x128xbf16>, vector<128x128xf32> -> vector<128x128xf32>
    %c0_19 = arith.constant 0 : index
    %c0_20 = arith.constant 0 : index
    %24 = vector.load %arg5[%c0_19, %c0_20] : memref<1x128xf32, #tpu.memory_space<vmem>>, vector<1x128xf32>
    %25 = vector.broadcast %24 : vector<1x128xf32> to vector<128x128xf32>
    %26 = arith.addf %23, %25 : vector<128x128xf32>
    %cst_21 = arith.constant 0.000000e+00 : f32
    %27 = vector.broadcast %cst_21 : f32 to vector<128x128xf32>
    %28 = arith.maximumf %26, %27 : vector<128x128xf32>
    %29 = arith.truncf %28 : vector<128x128xf32> to vector<128x128xbf16>
    %c0_22 = arith.constant 0 : index
    %c0_23 = arith.constant 0 : index
    %30 = vector.load %arg6[%c0_22, %c0_23] : memref<128x128xbf16, #tpu.memory_space<vmem>>, vector<128x128xbf16>
    %cst_24 = arith.constant dense<0.000000e+00> : vector<128x128xf32>
    %31 = tpu.matmul %29, %30, %cst_24 {dimension_numbers = #tpu.dot_dimension_numbers<[1], [0], [0], [1], [0, 0, 1, 1], [], []>} : vector<128x128xbf16>, vector<128x128xbf16>, vector<128x128xf32> -> vector<128x128xf32>
    %c0_25 = arith.constant 0 : index
    %c0_26 = arith.constant 0 : index
    %32 = vector.load %arg7[%c0_25, %c0_26] : memref<1x128xf32, #tpu.memory_space<vmem>>, vector<1x128xf32>
    %33 = vector.broadcast %32 : vector<1x128xf32> to vector<128x128xf32>
    %34 = arith.addf %31, %33 : vector<128x128xf32>
    %cst_27 = arith.constant 0.000000e+00 : f32
    %35 = vector.broadcast %cst_27 : f32 to vector<128x128xf32>
    %36 = arith.maximumf %34, %35 : vector<128x128xf32>
    %c0_28 = arith.constant 0 : index
    %c0_29 = arith.constant 0 : index
    %37 = vector.load %arg8[%c0_28, %c0_29] : memref<128x1xf32, #tpu.memory_space<vmem>>, vector<128x1xf32>
    %c0_30 = arith.constant 0 : index
    %c0_31 = arith.constant 0 : index
    %38 = vector.load %arg9[%c0_30, %c0_31] : memref<1x128xf32, #tpu.memory_space<vmem>>, vector<1x128xf32>
    %39 = tpu.transpose %36, [1, 0] : vector<128x128xf32> -> vector<128x128xf32>
    %40 = vector.broadcast %37 : vector<128x1xf32> to vector<128x128xf32>
    %41 = arith.mulf %39, %40 : vector<128x128xf32>
    %cst_32 = arith.constant dense<0.000000e+00> : vector<128xf32>
    %42 = vector.multi_reduction <add>, %41, %cst_32 [0] : vector<128x128xf32> to vector<128xf32>
    %43 = vector.shape_cast %42 : vector<128xf32> to vector<1x128xf32>
    %44 = arith.addf %43, %38 : vector<1x128xf32>
    %c0_33 = arith.constant 0 : index
    %c0_34 = arith.constant 0 : index
    %c0_35 = arith.constant 0 : index
    %45 = vector.load %arg10[%c0_33, %c0_34, %c0_35] : memref<1x1x128xf32, #tpu.memory_space<vmem>>, vector<1x1x128xf32>
    %46 = vector.shape_cast %45 : vector<1x1x128xf32> to vector<1x128xf32>
    %47 = vector.shape_cast %44 : vector<1x128xf32> to vector<1x1x128xf32>
    tpu.vector_store %arg10[%c0_33, %c0_34, %c0_35], %47 {strides = array<i32>} : memref<1x1x128xf32, #tpu.memory_space<vmem>>, vector<1x1x128xf32>,
    return
  }
  func.func @transform_0(%arg0: i32) -> (i32, i32) {
    %c0_i32 = arith.constant 0 : i32
    %c0_i32_0 = arith.constant 0 : i32
    return %arg0, %c0_i32 : i32, i32
  }
  func.func @transform_1(%arg0: i32) -> (i32, i32, i32) {
    %c0_i32 = arith.constant 0 : i32
    %c0_i32_0 = arith.constant 0 : i32
    %c0_i32_1 = arith.constant 0 : i32
    %c0_i32_2 = arith.constant 0 : i32
    return %c0_i32, %c0_i32_0, %c0_i32_1 : i32, i32, i32
  }
  func.func @transform_2(%arg0: i32) -> (i32, i32) {
    %c0_i32 = arith.constant 0 : i32
    %c0_i32_0 = arith.constant 0 : i32
    %c0_i32_1 = arith.constant 0 : i32
    return %c0_i32, %c0_i32_0 : i32, i32
  }
  func.func @transform_3(%arg0: i32) -> (i32, i32) {
    %c0_i32 = arith.constant 0 : i32
    %c0_i32_0 = arith.constant 0 : i32
    %c0_i32_1 = arith.constant 0 : i32
    return %c0_i32, %c0_i32_0 : i32, i32
  }
  func.func @transform_4(%arg0: i32) -> (i32, i32) {
    %c0_i32 = arith.constant 0 : i32
    %c0_i32_0 = arith.constant 0 : i32
    %c0_i32_1 = arith.constant 0 : i32
    return %c0_i32, %c0_i32_0 : i32, i32
  }
  func.func @transform_5(%arg0: i32) -> (i32, i32) {
    %c0_i32 = arith.constant 0 : i32
    %c0_i32_0 = arith.constant 0 : i32
    %c0_i32_1 = arith.constant 0 : i32
    return %c0_i32, %c0_i32_0 : i32, i32
  }
  func.func @transform_6(%arg0: i32) -> (i32, i32) {
    %c0_i32 = arith.constant 0 : i32
    %c0_i32_0 = arith.constant 0 : i32
    %c0_i32_1 = arith.constant 0 : i32
    return %c0_i32, %c0_i32_0 : i32, i32
  }
  func.func @transform_7(%arg0: i32) -> (i32, i32) {
    %c0_i32 = arith.constant 0 : i32
    %c0_i32_0 = arith.constant 0 : i32
    %c0_i32_1 = arith.constant 0 : i32
    return %c0_i32, %c0_i32_0 : i32, i32
  }
  func.func @transform_8(%arg0: i32) -> (i32, i32) {
    %c0_i32 = arith.constant 0 : i32
    %c0_i32_0 = arith.constant 0 : i32
    %c0_i32_1 = arith.constant 0 : i32
    return %c0_i32, %c0_i32_0 : i32, i32
  }
  func.func @transform_9(%arg0: i32) -> (i32, i32, i32) {
    %c0_i32 = arith.constant 0 : i32
    %c0_i32_0 = arith.constant 0 : i32
    %c0_i32_1 = arith.constant 0 : i32
    return %arg0, %c0_i32, %c0_i32_0 : i32, i32, i32
  }
}

</mosaic_0001>

<bundles_post_ra>
// kernel: net_forward.1
= control target key start
LH: loop header
LB: loop body
LE: loop exit
PB: predicated region body
PF: predicated region fallthrough
CT: control target
= control target key end

     0   :  { %14 = vsyncpa [#allocation3], 0  ;;  %s4260_s0 = inlined_call_operand.vmem [shape: bf16[128,196], index: 0, kind: input, shape index: {}]   ;;  %s4261_s1 = inlined_call_operand.hbm [shape: bf16[4,196,256], index: 1, kind: input, shape index: {}]   ;;  %s4262_s2 = inlined_call_operand.vmem [shape: f32[1,256], index: 2, kind: input, shape index: {}]   ;;  %s4263_s3 = inlined_call_operand.vmem [shape: bf16[256,128], index: 3, kind: input, shape index: {}]   ;;  %s4264_s4 = inlined_call_operand.vmem [shape: f32[1,128], index: 4, kind: input, shape index: {}]   ;;  %s4265_s5 = inlined_call_operand.vmem [shape: bf16[128,128], index: 5, kind: input, shape index: {}]   ;;  %s4266_s6 = inlined_call_operand.vmem [shape: f32[1,128], index: 6, kind: input, shape index: {}]   ;;  %s4267_s7 = inlined_call_operand.hbm [shape: f32[128,1], index: 7, kind: input, shape index: {}]   ;;  %s4268_s8 = inlined_call_operand.vmem [shape: f32[1,128], index: 8, kind: input, shape index: {}]   ;;  %s4269_s9 = inlined_call_operand.vmem [shape: f32[1,1,128], index: 9, kind: output, shape index: {}]  }
   0x1   :  { %s22_s11 = sshll.u32 %s4261_s1, 4  ;;  %s23_s11 = int_to_ptr.hbm [resolvable:$true] %s22_s11 }
   0x2   :  { %15 = vsyncpa [#allocation5], 0  ;;  %s3147_s12 = smov [#allocation2]   ;;  %s45_s16 = sshll.u32 %s4267_s7, 4  ;;  %s46_s16 = int_to_ptr.hbm [resolvable:$true] %s45_s16 }
   0x3   :  { %s24_s13 = sshll.u32 %s3147_s12, 4  ;;  %s3148_s17 = smov 128   ;;  %s25_s13 = int_to_ptr.vmem [resolvable:$true] %s24_s13 }
   0x4   :  { %s3149_s18 = smov 8   ;;  %s3150_s19 = smov [#allocation4]  }
   0x5   :  { %30 = dma.hbm_to_vmem [thread:$0]  %s23_s11, 12800, %s25_s13, [#allocation3], %s3148_s17, %s3148_s17, %s3149_s18  }
   0x6   :  { %s47_s20 = sshll.u32 %s3150_s19, 4  ;;  %s48_s20 = int_to_ptr.vmem [resolvable:$true] %s47_s20 }
   0x7   :  { %53 = dma.hbm_to_vmem [thread:$0]  %s46_s16, 2048, %s48_s20, [#allocation5], %s3148_s17, %s3148_s17, %s3149_s18  }
   0x8   :  { %3143 = dma.done.wait [#allocation3], 12800  }
   0x9   :  { %3144 = vsyncadd [#allocation3], 4294954496 }
   0xa   :  { %3145 = dma.done.wait [#allocation5], 2048  }
   0xb   :  { %3146 = vsyncadd [#allocation5], 4294965248  ;;  %v2455_v0 = vld [vmem:[#allocation2 + $0x70] sm:$0xf]  ;;  %v2972_v1 = vld [vmem:[#allocation2 + $0x74] sm:$0xf0] }
   0xc   :  { %v105_v2 = vld [vmem:[#allocation2 + $0xc0] sm:$0x33]  ;;  %v2456_v3 = vor.u32 %v2972_v1, %v2455_v0  ;;  %v2970_v7 = vld [vmem:[#allocation2 + $0x64] sm:$0xf0]  ;;  %vm328_vm0 = vcmask 1041408   ;;  %vm303_vm1 = vcmask 556032  }
   0xd   :  { %v251_v4 = vunpack.c.l.b16 %v105_v2  ;;  %v252_v5 = vunpack.c.h.b16 %v105_v2  ;;  %v2447_v6 = vld [vmem:[#allocation2 + $0x60] sm:$0xf]  ;;  %v2487_v8 = vld [vmem:[#allocation2 + $0xb0] sm:$0xf]  ;;  %v2980_v12 = vld [vmem:[#allocation2 + $0xb4] sm:$0xf0] }
   0xe   :  { %3077 = vmatpush.bf16.msra.mxu2 %v2456_v3  ;;  %v2448_v11 = vor.u32 %v2970_v7, %v2447_v6  ;;  %v2979_v13 = vld [vmem:[#allocation2 + $0xb4] sm:$0xf]  ;;  %v2489_v14 = vld [vmem:[#allocation2 + $0xb8] sm:$0xf0]  ;;  %v2439_v15 = vld [vmem:[#allocation2 + $0x50] sm:$0xf]  ;;  %335 = vmatpush.bf16.msra.mxu0 %v2456_v3  ;;  %v2488_v19 = vor.u32 %v2980_v12, %v2487_v8 }
   0xf   :  { %v277_v9 = vpack.c.b16 %v251_v4, %v251_v4  ;;  %v278_v10 = vpack.c.b16 %v252_v5, %v252_v5  ;;  %v2968_v16 = vld [vmem:[#allocation2 + $0x54] sm:$0xf0]  ;;  %v2492_v20 = vor.u32 %v2979_v13, %v2489_v14  ;;  %v2479_v21 = vld [vmem:[#allocation2 + $0xa0] sm:$0xf]  ;;  %v2978_v23 = vld [vmem:[#allocation2 + $0xa4] sm:$0xf0] }
  0x10   :  { %v2440_v22 = vor.u32 %v2968_v16, %v2439_v15  ;;  %v2977_v24 = vld [vmem:[#allocation2 + $0xa4] sm:$0xf]  ;;  %v2481_v25 = vld [vmem:[#allocation2 + $0xa8] sm:$0xf0]  ;;  %v2431_v26 = vld [vmem:[#allocation2 + $0x40] sm:$0xf]  ;;  %v2480_v28 = vor.u32 %v2978_v23, %v2479_v21 }
  0x11   :  { %v330_v17 = vsel %vm328_vm0, %v277_v9, 0  ;;  %v333_v18 = vsel %vm328_vm0, %v278_v10, 0  ;;  %v2966_v27 = vld [vmem:[#allocation2 + $0x44] sm:$0xf0]  ;;  %v2484_v29 = vor.u32 %v2977_v24, %v2481_v25  ;;  %v2471_v30 = vld [vmem:[#allocation2 + $0x90] sm:$0xf] }
  0x12   :  { %387 = vmatpush.bf16.msra.mxu1 %v330_v17  ;;  %485 = vmatpush.bf16.msra.mxu3 %v333_v18  ;;  %v2432_v31 = vor.u32 %v2966_v27, %v2431_v26  ;;  %v2976_v32 = vld [vmem:[#allocation2 + $0x94] sm:$0xf0]  ;;  %v2975_v33 = vld [vmem:[#allocation2 + $0x94] sm:$0xf]  ;;  %v2473_v34 = vld [vmem:[#allocation2 + $0x98] sm:$0xf0] }
  0x13   :  { %3078 = vmatpush.bf16.msra.mxu2 %v2448_v11  ;;  %336 = vmatpush.bf16.msra.mxu0 %v2448_v11  ;;  %v2423_v35 = vld [vmem:[#allocation2 + $0x30] sm:$0xf]  ;;  %v2964_v36 = vld [vmem:[#allocation2 + $0x34] sm:$0xf0]  ;;  %v2472_v37 = vor.u32 %v2976_v32, %v2471_v30  ;;  %v2476_v38 = vor.u32 %v2975_v33, %v2473_v34  ;;  %v2463_v39 = vld [vmem:[#allocation2 + $0x80] sm:$0xf] }
  0x14   :  { %v2974_v40 = vld [vmem:[#allocation2 + $0x84] sm:$0xf0]  ;;  %v2973_v41 = vld [vmem:[#allocation2 + $0x84] sm:$0xf]  ;;  %v2424_v42 = vor.u32 %v2964_v36, %v2423_v35  ;;  %v2465_v43 = vld [vmem:[#allocation2 + $0x88] sm:$0xf0] }
  0x15   :  { %v2415_v44 = vld [vmem:[#allocation2 + $0x20] sm:$0xf]  ;;  %v2962_v45 = vld [vmem:[#allocation2 + $0x24] sm:$0xf0]  ;;  %v2464_v46 = vor.u32 %v2974_v40, %v2463_v39  ;;  %v2468_v47 = vor.u32 %v2973_v41, %v2465_v43  ;;  %v2941_v48 = vld [vmem:[%s4260_s0 + $0x4] sm:$0xf] }
  0x16   :  { %388 = vmatpush.bf16.msra.mxu1 %v2488_v19  ;;  %486 = vmatpush.bf16.msra.mxu3 %v2492_v20  ;;  %v2337_v49 = vld [vmem:[%s4260_s0 + $0x8] sm:$0xf0]  ;;  %v2416_v50 = vor.u32 %v2962_v45, %v2415_v44  ;;  %v2407_v51 = vld [vmem:[#allocation2 + $0x10] sm:$0xf]  ;;  %v2960_v52 = vld [vmem:[#allocation2 + $0x14] sm:$0xf0] }
  0x17   :  { %3079 = vmatpush.bf16.msra.mxu2 %v2440_v22  ;;  %337 = vmatpush.bf16.msra.mxu0 %v2440_v22  ;;  %v3216_v53 = vor.u32 %v2941_v48, %v2337_v49  ;;  %v2408_v54 = vor.u32 %v2960_v52, %v2407_v51  ;;  %v2399_v55 = vld [vmem:[#allocation2] sm:$0xf]  ;;  %v2958_v56 = vld [vmem:[#allocation2 + $0x4] sm:$0xf0]  ;;  %v2971_v57 = vld [vmem:[#allocation2 + $0x74] sm:$0xf] }
  0x18   :  { %v2457_v58 = vld [vmem:[#allocation2 + $0x78] sm:$0xf0]  ;;  %v2400_v59 = vor.u32 %v2958_v56, %v2399_v55  ;;  %v2351_v60 = vld [vmem:[%s4260_s0 + $0x20] sm:$0xf]  ;;  %v2946_v61 = vld [vmem:[%s4260_s0 + $0x24] sm:$0xf0] }
  0x19   :  { %v2460_v62 = vor.u32 %v2971_v57, %v2457_v58  ;;  %v2969_v63 = vld [vmem:[#allocation2 + $0x64] sm:$0xf]  ;;  %v2449_v0 = vld [vmem:[#allocation2 + $0x68] sm:$0xf0]  ;;  %v3228_v1 = vor.u32 %v2946_v61, %v2351_v60  ;;  %v2967_v3 = vld [vmem:[#allocation2 + $0x54] sm:$0xf] }
  0x1a   :  { %389 = vmatpush.bf16.msra.mxu1 %v2480_v28  ;;  %487 = vmatpush.bf16.msra.mxu3 %v2484_v29  ;;  %v2452_v2 = vor.u32 %v2969_v63, %v2449_v0  ;;  %v2441_v4 = vld [vmem:[#allocation2 + $0x58] sm:$0xf0]  ;;  %v2943_v5 = vld [vmem:[%s4260_s0 + $0x14] sm:$0xf]  ;;  %v2965_v9 = vld [vmem:[#allocation2 + $0x44] sm:$0xf] }
  0x1b   :  { %3080 = vmatpush.bf16.msra.mxu2 %v2432_v31  ;;  %338 = vmatpush.bf16.msra.mxu0 %v2432_v31  ;;  %v2345_v6 = vld [vmem:[%s4260_s0 + $0x18] sm:$0xf0]  ;;  %v2444_v7 = vor.u32 %v2967_v3, %v2441_v4  ;;  %v2433_v10 = vld [vmem:[#allocation2 + $0x48] sm:$0xf0]  ;;  %v2359_v12 = vld [vmem:[%s4260_s0 + $0x30] sm:$0xf] }
  0x1c   :  { %v3237_v8 = vor.u32 %v2943_v5, %v2345_v6  ;;  %v2436_v11 = vor.u32 %v2965_v9, %v2433_v10  ;;  %v2948_v13 = vld [vmem:[%s4260_s0 + $0x34] sm:$0xf0]  ;;  %v2945_v15 = vld [vmem:[%s4260_s0 + $0x24] sm:$0xf]  ;;  %v2353_v16 = vld [vmem:[%s4260_s0 + $0x28] sm:$0xf0] }
  0x1d   :  { %v3249_v14 = vor.u32 %v2948_v13, %v2359_v12  ;;  %v2963_v17 = vld [vmem:[#allocation2 + $0x34] sm:$0xf]  ;;  %v2425_v18 = vld [vmem:[#allocation2 + $0x38] sm:$0xf0]  ;;  %v3258_v20 = vor.u32 %v2945_v15, %v2353_v16  ;;  %v2961_v21 = vld [vmem:[#allocation2 + $0x24] sm:$0xf] }
  0x1e   :  { %390 = vmatpush.bf16.msra.mxu1 %v2472_v37  ;;  %488 = vmatpush.bf16.msra.mxu3 %v2476_v38  ;;  %v2428_v19 = vor.u32 %v2963_v17, %v2425_v18  ;;  %v2417_v22 = vld [vmem:[#allocation2 + $0x28] sm:$0xf0]  ;;  %v2367_v24 = vld [vmem:[%s4260_s0 + $0x40] sm:$0xf]  ;;  %v2950_v25 = vld [vmem:[%s4260_s0 + $0x44] sm:$0xf0] }
  0x1f   :  { %3081 = vmatpush.bf16.msra.mxu2 %v2424_v42  ;;  %339 = vmatpush.bf16.msra.mxu0 %v2424_v42  ;;  %v2420_v23 = vor.u32 %v2961_v21, %v2417_v22  ;;  %v3270_v26 = vor.u32 %v2950_v25, %v2367_v24  ;;  %v2947_v27 = vld [vmem:[%s4260_s0 + $0x34] sm:$0xf]  ;;  %v2361_v28 = vld [vmem:[%s4260_s0 + $0x38] sm:$0xf0]  ;;  %v2375_v33 = vld [vmem:[%s4260_s0 + $0x50] sm:$0xf] }
  0x20   :  { %v3279_v29 = vor.u32 %v2947_v27, %v2361_v28  ;;  %v2959_v30 = vld [vmem:[#allocation2 + $0x14] sm:$0xf]  ;;  %v2409_v31 = vld [vmem:[#allocation2 + $0x18] sm:$0xf0]  ;;  %v2952_v34 = vld [vmem:[%s4260_s0 + $0x54] sm:$0xf0] }
  0x21   :  { %v2412_v32 = vor.u32 %v2959_v30, %v2409_v31  ;;  %v3291_v35 = vor.u32 %v2952_v34, %v2375_v33  ;;  %v2949_v36 = vld [vmem:[%s4260_s0 + $0x44] sm:$0xf]  ;;  %v2369_v37 = vld [vmem:[%s4260_s0 + $0x48] sm:$0xf0]  ;;  %v2567_v42 = vld [vmem:[#allocation2 + $0x138] sm:$0xf] }
  0x22   :  { %391 = vmatpush.bf16.msra.mxu1 %v2464_v46  ;;  %489 = vmatpush.bf16.msra.mxu3 %v2468_v47  ;;  %v2957_v38 = vld [vmem:[#allocation2 + $0x4] sm:$0xf]  ;;  %v2401_v39 = vld [vmem:[#allocation2 + $0x8] sm:$0xf0]  ;;  %v3300_v41 = vor.u32 %v2949_v36, %v2369_v37  ;;  %v2996_v43 = vld [vmem:[#allocation2 + $0x13c] sm:$0xf0] }
  0x23   :  { %3082 = vmatpush.bf16.msra.mxu2 %v2416_v50  ;;  %340 = vmatpush.bf16.msra.mxu0 %v2416_v50  ;;  %v2404_v40 = vor.u32 %v2957_v38, %v2401_v39  ;;  %v2335_v44 = vld [vmem:[%s4260_s0] sm:$0xf]  ;;  %v2568_v45 = vor.u32 %v2996_v43, %v2567_v42  ;;  %v2942_v46 = vld [vmem:[%s4260_s0 + $0x4] sm:$0xf0]  ;;  %v2951_v52 = vld [vmem:[%s4260_s0 + $0x54] sm:$0xf] }
  0x24   :  { %4301 = vst [vmem:[#allocation8_spill] sm:$0xff] %v3300_v41  ;;  %v2383_v47 = vld [vmem:[%s4260_s0 + $0x60] sm:$0xf]  ;;  %v2954_v48 = vld [vmem:[%s4260_s0 + $0x64] sm:$0xf0]  ;;  %v3318_v49 = vor.u32 %v2942_v46, %v2335_v44 }
  0x25   :  { %2493 = vmatmul.msk.bf16.vlgmr.msra.gmra.mxu1 %vm303_vm1, %v3216_v53  ;;  %2501 = vmatmul.msk.bf16.vlgmr.msra.gmra.mxu3 %vm303_vm1, %v3216_v53  ;;  %v3321_v50 = vor.u32 %v2954_v48, %v2383_v47  ;;  %v556_v51 = vld [vmem:[#allocation2 + $0x188] sm:$0x33]  ;;  %v2994_v55 = vld [vmem:[#allocation2 + $0x12c] sm:$0xf0]  ;;  %v2377_v57 = vld [vmem:[%s4260_s0 + $0x58] sm:$0xf0] }
  0x26   :  { %688 = vmatpush.bf16.msrb.mxu1 %v2568_v45  ;;  %v630_v56 = vunpack.c.l.b16 %v556_v51  ;;  %v631_v58 = vunpack.c.h.b16 %v556_v51  ;;  %v2551_v60 = vld [vmem:[#allocation2 + $0x118] sm:$0xf]  ;;  %v2992_v61 = vld [vmem:[#allocation2 + $0x11c] sm:$0xf0]  ;;  %v2391_v9 = vld [vmem:[%s4260_s0 + $0x70] sm:$0xf] }
  0x27   :  { %3083 = vmatpush.bf16.msra.mxu2 %v2408_v54  ;;  %341 = vmatpush.bf16.msra.mxu0 %v2408_v54  ;;  %v2559_v54 = vld [vmem:[#allocation2 + $0x128] sm:$0xf]  ;;  %v2552_v0 = vor.u32 %v2992_v61, %v2551_v60  ;;  %v2599_v5 = vld [vmem:[#allocation2 + $0x178] sm:$0xf]  ;;  %v3004_v6 = vld [vmem:[#allocation2 + $0x17c] sm:$0xf0] }
  0x28   :  { %v657_v63 = vpack.c.b16 %v631_v58, %v631_v58  ;;  %v2543_v10 = vld [vmem:[#allocation2 + $0x108] sm:$0xf]  ;;  %v3002_v15 = vld [vmem:[#allocation2 + $0x16c] sm:$0xf0]  ;;  %v2535_v16 = vld [vmem:[#allocation2 + $0xf8] sm:$0xf] }
  0x29   :  { %v2591_v12 = vld [vmem:[#allocation2 + $0x168] sm:$0xf]  ;;  %v2988_v17 = vld [vmem:[#allocation2 + $0xfc] sm:$0xf0]  ;;  %v2956_v18 = vld [vmem:[%s4260_s0 + $0x74] sm:$0xf0] }
  0x2a   :  { %v686_v4 = vsel %vm328_vm0, %v657_v63, 0  ;;  %v2343_v21 = vld [vmem:[%s4260_s0 + $0x10] sm:$0xf]  ;;  %v2944_v22 = vld [vmem:[%s4260_s0 + $0x14] sm:$0xf0]  ;;  %v3352_v25 = vor.u32 %v2956_v18, %v2391_v9 }
  0x2b   :  { %3084 = vmatpush.bf16.msra.mxu2 %v2400_v59  ;;  %342 = vmatpush.bf16.msra.mxu0 %v2400_v59  ;;  %v2560_v59 = vor.u32 %v2994_v55, %v2559_v54  ;;  %v3350_v24 = vor.u32 %v2944_v22, %v2343_v21  ;;  %v2583_v27 = vld [vmem:[#allocation2 + $0x158] sm:$0xf]  ;;  %v3000_v28 = vld [vmem:[#allocation2 + $0x15c] sm:$0xf0]  ;;  %v2527_v31 = vld [vmem:[#allocation2 + $0xe8] sm:$0xf] }
  0x2c   :  { %v2584_v30 = vor.u32 %v3000_v28, %v2583_v27  ;;  %v2953_v33 = vld [vmem:[%s4260_s0 + $0x64] sm:$0xf]  ;;  %v2385_v34 = vld [vmem:[%s4260_s0 + $0x68] sm:$0xf0]  ;;  %v2575_v37 = vld [vmem:[#allocation2 + $0x148] sm:$0xf] }
  0x2d   :  { %689 = vmatpush.bf16.msrb.mxu1 %v2560_v59  ;;  %v2998_v38 = vld [vmem:[#allocation2 + $0x14c] sm:$0xf0]  ;;  %v2519_v42 = vld [vmem:[#allocation2 + $0xd8] sm:$0xf]  ;;  %v2984_v43 = vld [vmem:[#allocation2 + $0xdc] sm:$0xf0] }
  0x2e   :  { %353 = vmatmul.bf16.vlgmr.msra.gmra.mxu2 %v3228_v1  ;;  %343 = vmatmul.bf16.vlgmr.msra.gmra.mxu0 %v3318_v49  ;;  %v2576_v39 = vor.u32 %v2998_v38, %v2575_v37  ;;  %v2520_v44 = vor.u32 %v2984_v43, %v2519_v42  ;;  %v2511_v45 = vld [vmem:[#allocation2 + $0xc8] sm:$0xf]  ;;  %v2982_v46 = vld [vmem:[#allocation2 + $0xcc] sm:$0xf0]  ;;  %v3003_v48 = vld [vmem:[#allocation2 + $0x17c] sm:$0xf] }
  0x2f   :  { %433 = vmatpush.bf16.msrb.mxu2 %v2460_v62  ;;  %v656_v62 = vpack.c.b16 %v630_v56, %v630_v56  ;;  %v2512_v47 = vor.u32 %v2982_v46, %v2511_v45  ;;  %v2601_v51 = vld [vmem:[#allocation2 + $0x180] sm:$0xf0]  ;;  %v2955_v54 = vld [vmem:[%s4260_s0 + $0x74] sm:$0xf]  ;;  %v2393_v55 = vld [vmem:[%s4260_s0 + $0x78] sm:$0xf0] }
  0x30   :  { %v3375_v56 = vor.u32 %v2955_v54, %v2393_v55  ;;  %v3001_v58 = vld [vmem:[#allocation2 + $0x16c] sm:$0xf]  ;;  %v2593_v59 = vld [vmem:[#allocation2 + $0x170] sm:$0xf0]  ;;  %v2585_v9 = vld [vmem:[#allocation2 + $0x160] sm:$0xf0] }
  0x31   :  { %v683_v3 = vsel %vm328_vm0, %v656_v62, 0  ;;  %690 = vmatpush.bf16.msrb.mxu1 %v2552_v0  ;;  %v2596_v60 = vor.u32 %v3001_v58, %v2593_v59  ;;  %v2569_v21 = vld [vmem:[#allocation2 + $0x140] sm:$0xf0]  ;;  %v2993_v27 = vld [vmem:[#allocation2 + $0x12c] sm:$0xf] }
  0x32   :  { %740 = vmatpush.bf16.msrb.mxu3 %v683_v3  ;;  %v2561_v28 = vld [vmem:[#allocation2 + $0x130] sm:$0xf0]  ;;  %v2537_v54 = vld [vmem:[#allocation2 + $0x100] sm:$0xf0]  ;;  %v2985_v59 = vld [vmem:[#allocation2 + $0xec] sm:$0xf] }
  0x33   :  { %434 = vmatpush.bf16.msrb.mxu2 %v2452_v2  ;;  %v3330_v2 = vor.u32 %v2951_v52, %v2377_v57  ;;  %v2604_v52 = vor.u32 %v3003_v48, %v2601_v51  ;;  %v2577_v42 = vld [vmem:[#allocation2 + $0x150] sm:$0xf0] }
  0x34   :  { %v2545_v45 = vld [vmem:[#allocation2 + $0x110] sm:$0xf0] }
  0x35   :  { %2494 = vmatmul.msk.bf16.gmra.mxu1 %vm303_vm1, %v3237_v8  ;;  %2502 = vmatmul.msk.bf16.gmra.mxu3 %vm303_vm1, %v3237_v8 }
  0x37   :  { %435 = vmatpush.bf16.msrb.mxu2 %v2444_v7  ;;  %v2600_v7 = vor.u32 %v3004_v6, %v2599_v5 }
  0x39   :  { %741 = vmatpush.bf16.msrb.mxu3 %v2600_v7  ;;  %v2999_v7 = vld [vmem:[#allocation2 + $0x15c] sm:$0xf] }
  0x3b   :  { %436 = vmatpush.bf16.msrb.mxu2 %v2436_v11  ;;  %v2990_v11 = vld [vmem:[#allocation2 + $0x10c] sm:$0xf0] }
  0x3c   :  { %v2544_v13 = vor.u32 %v2990_v11, %v2543_v10  ;;  %v2588_v10 = vor.u32 %v2999_v7, %v2585_v9 }
  0x3e   :  { %358 = vmatmul.bf16.gmra.mxu2 %v3249_v14  ;;  %691 = vmatpush.bf16.msrb.mxu1 %v2544_v13 }
  0x3f   :  { %437 = vmatpush.bf16.msrb.mxu2 %v2428_v19  ;;  %v2592_v19 = vor.u32 %v3002_v15, %v2591_v12  ;;  %348 = vmatmul.bf16.gmra.mxu0 %v3350_v24 }
  0x41   :  { %742 = vmatpush.bf16.msrb.mxu3 %v2592_v19  ;;  %v2995_v19 = vld [vmem:[#allocation2 + $0x13c] sm:$0xf] }
  0x43   :  { %438 = vmatpush.bf16.msrb.mxu2 %v2420_v23  ;;  %v2536_v23 = vor.u32 %v2988_v17, %v2535_v16 }
  0x45   :  { %2495 = vmatmul.msk.bf16.gmra.mxu1 %vm303_vm1, %v3258_v20  ;;  %2503 = vmatmul.msk.bf16.gmra.mxu3 %vm303_vm1, %v3258_v20 }
  0x46   :  { %692 = vmatpush.bf16.msrb.mxu1 %v2536_v23  ;;  %743 = vmatpush.bf16.msrb.mxu3 %v2584_v30  ;;  %v2572_v23 = vor.u32 %v2995_v19, %v2569_v21  ;;  %v2564_v30 = vor.u32 %v2993_v27, %v2561_v28  ;;  %v2513_v19 = vld [vmem:[#allocation2 + $0xd0] sm:$0xf0]  ;;  %v2679_v28 = vld [vmem:[#allocation2 + $0x200] sm:$0xf] }
  0x47   :  { %439 = vmatpush.bf16.msrb.mxu2 %v2412_v32  ;;  %v2986_v32 = vld [vmem:[#allocation2 + $0xec] sm:$0xf0] }
  0x48   :  { %v2528_v36 = vor.u32 %v2986_v32, %v2527_v31  ;;  %786 = vmatpush.bf16.msrb.mxu0 %v2572_v23 }
  0x4a   :  { %693 = vmatpush.bf16.msrb.mxu1 %v2528_v36  ;;  %744 = vmatpush.bf16.msrb.mxu3 %v2576_v39  ;;  %v2553_v36 = vld [vmem:[#allocation2 + $0x120] sm:$0xf0]  ;;  %v2997_v39 = vld [vmem:[#allocation2 + $0x14c] sm:$0xf] }
  0x4b   :  { %440 = vmatpush.bf16.msrb.mxu2 %v2404_v40  ;;  %v3362_v40 = vor.u32 %v2953_v33, %v2385_v34  ;;  %v2991_v34 = vld [vmem:[#allocation2 + $0x11c] sm:$0xf]  ;;  %v2580_v43 = vor.u32 %v2997_v39, %v2577_v42  ;;  %v3018_v39 = vld [vmem:[#allocation2 + $0x1f4] sm:$0xf0] }
  0x4c   :  { %787 = vmatpush.bf16.msrb.mxu0 %v2564_v30  ;;  %v2556_v38 = vor.u32 %v2991_v34, %v2553_v36  ;;  %v3020_v30 = vld [vmem:[#allocation2 + $0x204] sm:$0xf0]  ;;  %v941_v36 = vld [vmem:[#allocation2 + $0x250] sm:$0x33] }
  0x4d   :  { %v2680_v34 = vor.u32 %v3020_v30, %v2679_v28  ;;  %v1015_v42 = vunpack.c.l.b16 %v941_v36  ;;  %v2655_v28 = vld [vmem:[#allocation2 + $0x1d0] sm:$0xf]  ;;  %v3014_v30 = vld [vmem:[#allocation2 + $0x1d4] sm:$0xf0] }
  0x4e   :  { %363 = vmatmul.bf16.gmra.mxu2 %v3270_v26  ;;  %694 = vmatpush.bf16.msrb.mxu1 %v2520_v44  ;;  %v2989_v44 = vld [vmem:[#allocation2 + $0x10c] sm:$0xf] }
  0x4f   :  { %838 = vmatpush.bf16.msra.mxu2 %v686_v4  ;;  %v2548_v46 = vor.u32 %v2989_v44, %v2545_v45  ;;  %v1041_v45 = vpack.c.b16 %v1015_v42, %v1015_v42  ;;  %v2647_v42 = vld [vmem:[#allocation2 + $0x1c0] sm:$0xf] }
  0x50   :  { %788 = vmatpush.bf16.msrb.mxu0 %v2556_v38  ;;  %v2671_v38 = vld [vmem:[#allocation2 + $0x1f0] sm:$0xf] }
  0x51   :  { %v2672_v44 = vor.u32 %v3018_v39, %v2671_v38 }
  0x52   :  { %695 = vmatpush.bf16.msrb.mxu1 %v2512_v47 }
  0x53   :  { %839 = vmatpush.bf16.msra.mxu2 %v2604_v52  ;;  %v2987_v52 = vld [vmem:[#allocation2 + $0xfc] sm:$0xf] }
  0x54   :  { %789 = vmatpush.bf16.msrb.mxu0 %v2548_v46  ;;  %v2540_v58 = vor.u32 %v2987_v52, %v2537_v54  ;;  %v2663_v54 = vld [vmem:[#allocation2 + $0x1e0] sm:$0xf] }
  0x55   :  { %2496 = vmatmul.msk.bf16.gmra.mxu1 %vm303_vm1, %v3279_v29  ;;  %2504 = vmatmul.msk.bf16.gmra.mxu3 %vm303_vm1, %v3279_v29 }
  0x56   :  { %1073 = vmatpush.bf16.msra.mxu1 %v2680_v34  ;;  %v3026_v34 = vld [vmem:[#allocation2 + $0x234] sm:$0xf0] }
  0x57   :  { %840 = vmatpush.bf16.msra.mxu2 %v2596_v60  ;;  %v2529_v60 = vld [vmem:[#allocation2 + $0xf0] sm:$0xf0] }
  0x58   :  { %790 = vmatpush.bf16.msrb.mxu0 %v2540_v58  ;;  %v3016_v58 = vld [vmem:[#allocation2 + $0x1e4] sm:$0xf0] }
  0x5a   :  { %1074 = vmatpush.bf16.msra.mxu1 %v2672_v44 }
  0x5b   :  { %841 = vmatpush.bf16.msra.mxu2 %v2588_v10  ;;  %v2983_v10 = vld [vmem:[#allocation2 + $0xdc] sm:$0xf] }
  0x5e   :  { %368 = vmatmul.bf16.gmra.mxu2 %v3291_v35 }
  0x5f   :  { %842 = vmatpush.bf16.msra.mxu2 %v2580_v43  ;;  %v1016_v43 = vunpack.c.h.b16 %v941_v36 }
  0x65   :  { %2497 = vmatmul.msk.bf16.gmra.mxu1 %vm303_vm1, %v3300_v41  ;;  %2505 = vmatmul.msk.bf16.gmra.mxu3 %vm303_vm1, %v3300_v41 }
  0x6e   :  { %373 = vmatmul.bf16.gmra.mxu2 %v3321_v50 }
  0x75   :  { %2498 = vmatmul.msk.bf16.gmra.mxu1 %vm303_vm1, %v3330_v2  ;;  %2506 = vmatmul.msk.bf16.gmra.mxu3 %vm303_vm1, %v3330_v2 }
  0x7e   :  { %378 = vmatmul.bf16.gmra.mxu2 %v3352_v25 }
  0x85   :  { %2499 = vmatmul.msk.bf16.gmra.mxu1 %vm303_vm1, %v3362_v40  ;;  %2507 = vmatmul.msk.bf16.gmra.mxu3 %vm303_vm1, %v3362_v40 }
  0x8e   :  { %441 = vmatmul.bf16.vlgmr.msrb.gmra.mxu2 %v3318_v49 }
  0x95   :  { %2500 = vmatmul.msk.bf16.gmra.mxu1 %vm303_vm1, %v3375_v56  ;;  %2508 = vmatmul.msk.bf16.gmra.mxu3 %vm303_vm1, %v3375_v56 }
  0x9e   :  { %446 = vmatmul.bf16.gmra.mxu2 %v3350_v24 }
  0xa2   :  { %v3382_v57 = vpop.f32.mrf.mxu1 }
  0xa5   :  { %2605 = vmatmul.msk.bf16.vlgmr.msrb.gmra.mxu3 %vm303_vm1, %v3216_v53  ;;  %696 = vmatmul.bf16.vlgmr.msrb.gmra.mxu1 %v3318_v49 }
  0xa8   :  { %v3387_v61 = vpop.f32.mrf.mxu3 }
  0xaa   :  { %v3389_v62 = vpop.f32.mrf.mxu1 }
  0xae   :  { %451 = vmatmul.bf16.gmra.mxu2 %v3228_v1 }
  0xb0   :  { %v3392_v63 = vpop.f32.mrf.mxu3 }
  0xb1   :  { %v354_v0 = vpop.f32.mrf.mxu2 }
  0xb2   :  { %v3394_v3 = vpop.f32.mrf.mxu1 }
  0xb5   :  { %2606 = vmatmul.msk.bf16.gmra.mxu3 %vm303_vm1, %v3237_v8  ;;  %701 = vmatmul.bf16.gmra.mxu1 %v3350_v24 }
  0xb8   :  { %v3399_v4 = vpop.f32.mrf.mxu3 }
  0xb9   :  { %v356_v5 = vpop.f32.mrf.mxu2 }
  0xba   :  { %v3401_v6 = vpop.f32.mrf.mxu1 }
  0xbe   :  { %456 = vmatmul.bf16.gmra.mxu2 %v3249_v14 }
  0xc0   :  { %v3404_v11 = vpop.f32.mrf.mxu3 }
  0xc1   :  { %v359_v12 = vpop.f32.mrf.mxu2 }
  0xc2   :  { %v403_v13 = vpop.f32.mrf.mxu1 }
  0xc3   :  { %v3406_v15 = vadd.f32 %v403_v13, %v354_v0  ;;  %v2532_v0 = vor.u32 %v2985_v59, %v2529_v60 }
  0xc5   :  { %4302 = vst [vmem:[#allocation9_spill] sm:$0xff] %v3406_v15  ;;  %2607 = vmatmul.msk.bf16.gmra.mxu3 %vm303_vm1, %v3258_v20  ;;  %706 = vmatmul.bf16.gmra.mxu1 %v3228_v1 }
  0xc6   :  { %791 = vmatpush.bf16.msrb.mxu0 %v2532_v0  ;;  %v2664_v0 = vor.u32 %v3016_v58, %v2663_v54  ;;  %v3024_v54 = vld [vmem:[#allocation2 + $0x224] sm:$0xf0] }
  0xc8   :  { %v3411_v16 = vpop.f32.mrf.mxu3  ;;  %1075 = vmatpush.bf16.msra.mxu1 %v2664_v0 }
  0xc9   :  { %v361_v17 = vpop.f32.mrf.mxu2 }
  0xca   :  { %v405_v18 = vpop.f32.mrf.mxu1 }
  0xcb   :  { %v3413_v22 = vadd.f32 %v405_v18, %v356_v5 }
  0xcd   :  { %4303 = vst [vmem:[#allocation10_spill] sm:$0xff] %v3413_v22 }
  0xce   :  { %461 = vmatmul.bf16.gmra.mxu2 %v3270_v26 }
  0xd0   :  { %v3416_v31 = vpop.f32.mrf.mxu3 }
  0xd1   :  { %v364_v32 = vpop.f32.mrf.mxu2 }
  0xd2   :  { %v408_v33 = vpop.f32.mrf.mxu1 }
  0xd3   :  { %v3418_v37 = vadd.f32 %v408_v33, %v359_v12  ;;  %v2521_v12 = vld [vmem:[#allocation2 + $0xe0] sm:$0xf0] }
  0xd4   :  { %v2524_v18 = vor.u32 %v2983_v10, %v2521_v12  ;;  %v3019_v10 = vld [vmem:[#allocation2 + $0x204] sm:$0xf]  ;;  %v2681_v12 = vld [vmem:[#allocation2 + $0x208] sm:$0xf0] }
  0xd5   :  { %4304 = vst [vmem:[#allocation11_spill] sm:$0xff] %v3418_v37  ;;  %2608 = vmatmul.msk.bf16.gmra.mxu3 %vm303_vm1, %v3279_v29  ;;  %711 = vmatmul.bf16.gmra.mxu1 %v3249_v14 }
  0xd6   :  { %792 = vmatpush.bf16.msrb.mxu0 %v2524_v18  ;;  %v2711_v18 = vld [vmem:[#allocation2 + $0x240] sm:$0xf] }
  0xd8   :  { %v3423_v47 = vpop.f32.mrf.mxu3 }
  0xd9   :  { %4305 = vst [vmem:[#allocation12_spill] sm:$0xff] %v3423_v47  ;;  %v366_v48 = vpop.f32.mrf.mxu2 }
  0xda   :  { %v410_v51 = vpop.f32.mrf.mxu1 }
  0xdb   :  { %v3425_v55 = vadd.f32 %v410_v51, %v361_v17  ;;  %v2981_v17 = vld [vmem:[#allocation2 + $0xcc] sm:$0xf]  ;;  %v1042_v51 = vpack.c.b16 %v1016_v43, %v1016_v43  ;;  %v3012_v43 = vld [vmem:[#allocation2 + $0x1c4] sm:$0xf0] }
  0xdc   :  { %v2516_v21 = vor.u32 %v2981_v17, %v2513_v19  ;;  %v2684_v17 = vor.u32 %v3019_v10, %v2681_v12  ;;  %v3028_v19 = vld [vmem:[#allocation2 + $0x244] sm:$0xf0]  ;;  %v2687_v10 = vld [vmem:[#allocation2 + $0x210] sm:$0xf]  ;;  %v3022_v12 = vld [vmem:[#allocation2 + $0x214] sm:$0xf0] }
  0xdd   :  { %4306 = vst [vmem:[#allocation13_spill] sm:$0xff] %v3425_v55  ;;  %v1071_v60 = vsel %vm328_vm0, %v1042_v51, 0 }
  0xde   :  { %466 = vmatmul.bf16.gmra.mxu2 %v3291_v35  ;;  %793 = vmatpush.bf16.msrb.mxu0 %v2516_v21  ;;  %v2712_v21 = vor.u32 %v3028_v19, %v2711_v18  ;;  %v2631_v19 = vld [vmem:[#allocation2 + $0x1a0] sm:$0xf] }
  0xdf   :  { %1223 = vmatpush.bf16.msrb.mxu2 %v1071_v60  ;;  %v3010_v60 = vld [vmem:[#allocation2 + $0x1b4] sm:$0xf0] }
  0xe0   :  { %v3428_v5 = vpop.f32.mrf.mxu3 }
  0xe1   :  { %4307 = vst [vmem:[#allocation14_spill] sm:$0xff] %v3428_v5  ;;  %v369_v7 = vpop.f32.mrf.mxu2  ;;  %794 = vmatmul.bf16.vlgmr.msrb.gmra.mxu0 %v3318_v49 }
  0xe2   :  { %v413_v9 = vpop.f32.mrf.mxu1  ;;  %1171 = vmatpush.bf16.msra.mxu0 %v2684_v17 }
  0xe3   :  { %v3430_v13 = vadd.f32 %v413_v9, %v364_v32 }
  0xe5   :  { %4308 = vst [vmem:[#allocation15_spill] sm:$0xff] %v3430_v13  ;;  %2609 = vmatmul.msk.bf16.gmra.mxu3 %vm303_vm1, %v3300_v41  ;;  %716 = vmatmul.bf16.gmra.mxu1 %v3270_v26 }
  0xe8   :  { %v3435_v23 = vpop.f32.mrf.mxu3 }
  0xe9   :  { %4309 = vst [vmem:[#allocation16_spill] sm:$0xff] %v3435_v23  ;;  %v371_v27 = vpop.f32.mrf.mxu2 }
  0xea   :  { %v415_v33 = vpop.f32.mrf.mxu1 }
  0xeb   :  { %v3437_v32 = vadd.f32 %v415_v33, %v366_v48  ;;  %v1068_v48 = vsel %vm328_vm0, %v1041_v45, 0  ;;  %v2656_v33 = vor.u32 %v3014_v30, %v2655_v28  ;;  %v2648_v45 = vor.u32 %v3012_v43, %v2647_v42  ;;  %v2623_v42 = vld [vmem:[#allocation2 + $0x190] sm:$0xf]  ;;  %v3006_v43 = vld [vmem:[#allocation2 + $0x194] sm:$0xf0] }
  0xec   :  { %1125 = vmatpush.bf16.msra.mxu3 %v1068_v48  ;;  %v2695_v48 = vld [vmem:[#allocation2 + $0x220] sm:$0xf] }
  0xed   :  { %4310 = vst [vmem:[#allocation17_spill] sm:$0xff] %v3437_v32  ;;  %1076 = vmatpush.bf16.msra.mxu1 %v2656_v33  ;;  %v2696_v58 = vor.u32 %v3024_v54, %v2695_v48  ;;  %v3017_v33 = vld [vmem:[#allocation2 + $0x1f4] sm:$0xf] }
  0xee   :  { %471 = vmatmul.bf16.gmra.mxu2 %v3321_v50 }
  0xf0   :  { %v3441_v46 = vpop.f32.mrf.mxu3  ;;  %1126 = vmatpush.bf16.msra.mxu3 %v2712_v21  ;;  %v3008_v21 = vld [vmem:[#allocation2 + $0x1a4] sm:$0xf0] }
  0xf1   :  { %4311 = vst [vmem:[#allocation18_spill] sm:$0xff] %v3441_v46  ;;  %v374_v52 = vpop.f32.mrf.mxu2  ;;  %1077 = vmatpush.bf16.msra.mxu1 %v2648_v45  ;;  %799 = vmatmul.bf16.gmra.mxu0 %v3350_v24  ;;  %v2632_v30 = vor.u32 %v3008_v21, %v2631_v19  ;;  %v3015_v19 = vld [vmem:[#allocation2 + $0x1e4] sm:$0xf]  ;;  %v2665_v21 = vld [vmem:[#allocation2 + $0x1e8] sm:$0xf0] }
  0xf2   :  { %v418_v59 = vpop.f32.mrf.mxu1  ;;  %v2633_v46 = vld [vmem:[#allocation2 + $0x1a8] sm:$0xf0] }
  0xf3   :  { %v3445_v9 = vadd.f32 %v418_v59, %v369_v7  ;;  %v2703_v7 = vld [vmem:[#allocation2 + $0x230] sm:$0xf] }
  0xf4   :  { %v2704_v38 = vor.u32 %v3026_v34, %v2703_v7  ;;  %v2639_v59 = vld [vmem:[#allocation2 + $0x1b0] sm:$0xf]  ;;  %v2673_v7 = vld [vmem:[#allocation2 + $0x1f8] sm:$0xf0] }
  0xf5   :  { %2610 = vmatmul.msk.bf16.gmra.mxu3 %vm303_vm1, %v3330_v2  ;;  %721 = vmatmul.bf16.gmra.mxu1 %v3291_v35  ;;  %v2640_v0 = vor.u32 %v3010_v60, %v2639_v59  ;;  %v2713_v59 = vld [vmem:[#allocation2 + $0x248] sm:$0xf0] }
  0xf6   :  { %1127 = vmatpush.bf16.msra.mxu3 %v2704_v38  ;;  %v2676_v38 = vor.u32 %v3017_v33, %v2673_v7 }
  0xf7   :  { %1078 = vmatpush.bf16.msra.mxu1 %v2640_v0 }
  0xf8   :  { %v3450_v36 = vpop.f32.mrf.mxu3  ;;  %1172 = vmatpush.bf16.msra.mxu0 %v2676_v38 }
  0xf9   :  { %4312 = vst [vmem:[#allocation19_spill] sm:$0xff] %v3450_v36  ;;  %v376_v39 = vpop.f32.mrf.mxu2 }
  0xfa   :  { %v420_v44 = vpop.f32.mrf.mxu1  ;;  %1128 = vmatpush.bf16.msra.mxu3 %v2696_v58 }
  0xfb   :  { %v3452_v51 = vadd.f32 %v420_v44, %v371_v27  ;;  %v2688_v27 = vor.u32 %v3022_v12, %v2687_v10  ;;  %1079 = vmatpush.bf16.msra.mxu1 %v2632_v30  ;;  %v2624_v44 = vor.u32 %v3006_v43, %v2623_v42  ;;  %v3025_v43 = vld [vmem:[#allocation2 + $0x234] sm:$0xf] }
  0xfd   :  { %4313 = vst [vmem:[#allocation20_spill] sm:$0xff] %v3452_v51  ;;  %v2825_v51 = vld [vmem:[#allocation2 + $0x310] sm:$0xf0] }
  0xfe   :  { %476 = vmatmul.bf16.gmra.mxu2 %v3352_v25  ;;  %1129 = vmatpush.bf16.msra.mxu3 %v2688_v27 }
  0xff   :  { %1080 = vmatpush.bf16.msra.mxu1 %v2624_v44  ;;  %v2705_v44 = vld [vmem:[#allocation2 + $0x238] sm:$0xf0] }
 0x100   :  { %v3456_v18 = vpop.f32.mrf.mxu3 }
 0x101   :  { %4314 = vst [vmem:[#allocation21_spill] sm:$0xff] %v3456_v18  ;;  %v379_v17 = vpop.f32.mrf.mxu2  ;;  %804 = vmatmul.bf16.gmra.mxu0 %v3228_v1  ;;  %v2641_v18 = vld [vmem:[#allocation2 + $0x1b8] sm:$0xf0] }
 0x102   :  { %v423_v28 = vpop.f32.mrf.mxu1 }
 0x103   :  { %v3458_v34 = vadd.f32 %v423_v28, %v374_v52  ;;  %v3027_v52 = vld [vmem:[#allocation2 + $0x244] sm:$0xf] }
 0x104   :  { %v2716_v60 = vor.u32 %v3027_v52, %v2713_v59  ;;  %v344_v52 = vpop.f32.mrf.mxu0  ;;  %v2708_v59 = vor.u32 %v3025_v43, %v2705_v44 }
 0x105   :  { %2611 = vmatmul.msk.bf16.gmra.mxu3 %vm303_vm1, %v3362_v40  ;;  %726 = vmatmul.bf16.gmra.mxu1 %v3321_v50 }
 0x106   :  { %1224 = vmatpush.bf16.msrb.mxu2 %v2716_v60  ;;  %v2657_v60 = vld [vmem:[#allocation2 + $0x1d8] sm:$0xf0] }
 0x108   :  { %v3463_v45 = vpop.f32.mrf.mxu3 }
 0x109   :  { %4315 = vst [vmem:[#allocation22_spill] sm:$0xff] %v3463_v45  ;;  %v381_v48 = vpop.f32.mrf.mxu2 }
 0x10a   :  { %v425_v54 = vpop.f32.mrf.mxu1  ;;  %1225 = vmatpush.bf16.msrb.mxu2 %v2708_v59 }
 0x10b   :  { %v3465_v58 = vadd.f32 %v425_v54, %v376_v39  ;;  %v2668_v39 = vor.u32 %v3015_v19, %v2665_v21  ;;  %v3013_v54 = vld [vmem:[#allocation2 + $0x1d4] sm:$0xf]  ;;  %v3496_v19 = vadd.f32 %v3382_v57, %v344_v52  ;;  %v3011_v52 = vld [vmem:[#allocation2 + $0x1c4] sm:$0xf] }
 0x10c   :  { %v3505_v44 = vpop.f32.mrf.mxu0 }
 0x10d   :  { %4316 = vst [vmem:[#allocation23_spill] sm:$0xff] %v3465_v58  ;;  %1173 = vmatpush.bf16.msra.mxu0 %v2668_v39 }
 0x10e   :  { %2613 = vmatmul.msk.bf16.vlgmr.msra.gmra.mxu2 %vm303_vm1, %v3216_v53 }
 0x110   :  { %v3470_v0 = vpop.f32.mrf.mxu3 }
 0x111   :  { %4317 = vst [vmem:[#allocation24_spill] sm:$0xff] %v3470_v0  ;;  %v3472_v10 = vpop.f32.mrf.mxu2  ;;  %809 = vmatmul.bf16.gmra.mxu0 %v3249_v14 }
 0x112   :  { %v428_v12 = vpop.f32.mrf.mxu1 }
 0x113   :  { %v3474_v27 = vadd.f32 %v428_v12, %v379_v17 }
 0x115   :  { %2612 = vmatmul.msk.bf16.gmra.mxu3 %vm303_vm1, %v3375_v56  ;;  %731 = vmatmul.bf16.gmra.mxu1 %v3352_v25 }
 0x118   :  { %v3479_v28 = vpop.f32.mrf.mxu3 }
 0x119   :  { %4318 = vst [vmem:[#allocation25_spill] sm:$0xff] %v3479_v28  ;;  %v3481_v30 = vpop.f32.mrf.mxu2 }
 0x11a   :  { %v430_v33 = vpop.f32.mrf.mxu1 }
 0x11b   :  { %v3483_v7 = vadd.f32 %v430_v33, %v381_v48  ;;  %v2660_v48 = vor.u32 %v3013_v54, %v2657_v60  ;;  %v2649_v60 = vld [vmem:[#allocation2 + $0x1c8] sm:$0xf0] }
 0x11d   :  { %4319 = vst [vmem:[#allocation26_spill] sm:$0xff] %v3483_v7  ;;  %1174 = vmatpush.bf16.msra.mxu0 %v2660_v48  ;;  %v2652_v48 = vor.u32 %v3011_v52, %v2649_v60  ;;  %v3023_v52 = vld [vmem:[#allocation2 + $0x224] sm:$0xf]  ;;  %v2697_v60 = vld [vmem:[#allocation2 + $0x228] sm:$0xf0] }
 0x11e   :  { %2614 = vmatmul.msk.bf16.gmra.mxu2 %vm303_vm1, %v3237_v8  ;;  %v2700_v45 = vor.u32 %v3023_v52, %v2697_v60 }
 0x120   :  { %v3488_v17 = vpop.f32.mrf.mxu3  ;;  %1226 = vmatpush.bf16.msrb.mxu2 %v2700_v45 }
 0x121   :  { %4320 = vst [vmem:[#allocation27_spill] sm:$0xff] %v3488_v17  ;;  %v3490_v38 = vpop.f32.mrf.mxu2  ;;  %814 = vmatmul.bf16.gmra.mxu0 %v3270_v26 }
 0x122   :  { %v697_v42 = vpop.f32.mrf.mxu1  ;;  %1175 = vmatpush.bf16.msra.mxu0 %v2652_v48 }
 0x125   :  { %2717 = vmatmul.msk.bf16.vlgmr.msra.gmra.mxu3 %vm303_vm1, %v3216_v53  ;;  %1081 = vmatmul.bf16.vlgmr.msra.gmra.mxu1 %v3318_v49 }
 0x128   :  { %v746_v12 = vpop.f32.mrf.mxu3 }
 0x129   :  { %v3498_v21 = vadd.f32 %v746_v12, %v697_v42  ;;  %v3500_v39 = vpop.f32.mrf.mxu2  ;;  %v349_v12 = vpop.f32.mrf.mxu0 }
 0x12a   :  { %v699_v33 = vpop.f32.mrf.mxu1  ;;  %v3517_v17 = vadd.f32 %v3394_v3, %v349_v12  ;;  %v3009_v12 = vld [vmem:[#allocation2 + $0x1b4] sm:$0xf] }
 0x12b   :  { %v2644_v36 = vor.u32 %v3009_v12, %v2641_v18 }
 0x12d   :  { %1176 = vmatpush.bf16.msra.mxu0 %v2644_v36 }
 0x12e   :  { %2615 = vmatmul.msk.bf16.gmra.mxu2 %vm303_vm1, %v3258_v20 }
 0x130   :  { %v748_v54 = vpop.f32.mrf.mxu3 }
 0x131   :  { %v3509_v59 = vadd.f32 %v748_v54, %v699_v33  ;;  %v3511_v57 = vpop.f32.mrf.mxu2  ;;  %819 = vmatmul.bf16.gmra.mxu0 %v3291_v35 }
 0x132   :  { %v702_v42 = vpop.f32.mrf.mxu1 }
 0x135   :  { %2718 = vmatmul.msk.bf16.gmra.mxu3 %vm303_vm1, %v3237_v8  ;;  %1086 = vmatmul.bf16.gmra.mxu1 %v3350_v24 }
 0x138   :  { %v751_v43 = vpop.f32.mrf.mxu3 }
 0x139   :  { %v3519_v28 = vadd.f32 %v751_v43, %v702_v42  ;;  %v3521_v33 = vpop.f32.mrf.mxu2 }
 0x13a   :  { %v704_v54 = vpop.f32.mrf.mxu1 }
 0x13e   :  { %2616 = vmatmul.msk.bf16.gmra.mxu2 %vm303_vm1, %v3279_v29 }
 0x140   :  { %v753_v48 = vpop.f32.mrf.mxu3 }
 0x141   :  { %v3528_v3 = vadd.f32 %v753_v48, %v704_v54  ;;  %v3530_v43 = vpop.f32.mrf.mxu2  ;;  %824 = vmatmul.bf16.gmra.mxu0 %v3321_v50  ;;  %v3021_v54 = vld [vmem:[#allocation2 + $0x214] sm:$0xf] }
 0x142   :  { %v707_v42 = vpop.f32.mrf.mxu1 }
 0x145   :  { %2719 = vmatmul.msk.bf16.gmra.mxu3 %vm303_vm1, %v3258_v20  ;;  %1091 = vmatmul.bf16.gmra.mxu1 %v3228_v1 }
 0x148   :  { %v756_v52 = vpop.f32.mrf.mxu3 }
 0x149   :  { %v3535_v60 = vadd.f32 %v756_v52, %v707_v42  ;;  %v3537_v0 = vpop.f32.mrf.mxu2  ;;  %v3007_v52 = vld [vmem:[#allocation2 + $0x1a4] sm:$0xf] }
 0x14a   :  { %4322 = vst [vmem:[#allocation29_spill] sm:$0xff] %v3537_v0  ;;  %v709_v45 = vpop.f32.mrf.mxu1  ;;  %v2636_v23 = vor.u32 %v3007_v52, %v2633_v46 }
 0x14b   :  { %4321 = vst [vmem:[#allocation28_spill] sm:$0xff] %v3535_v60  ;;  %v2689_v60 = vld [vmem:[#allocation2 + $0x218] sm:$0xf0] }
 0x14c   :  { %1177 = vmatpush.bf16.msra.mxu0 %v2636_v23  ;;  %v2692_v15 = vor.u32 %v3021_v54, %v2689_v60  ;;  %v3566_v60 = vpop.f32.mrf.mxu0 }
 0x14e   :  { %2617 = vmatmul.msk.bf16.gmra.mxu2 %vm303_vm1, %v3300_v41 }
 0x14f   :  { %1227 = vmatpush.bf16.msrb.mxu2 %v2692_v15 }
 0x150   :  { %v758_v18 = vpop.f32.mrf.mxu3 }
 0x151   :  { %v3544_v48 = vadd.f32 %v758_v18, %v709_v45  ;;  %v3546_v12 = vpop.f32.mrf.mxu2  ;;  %829 = vmatmul.bf16.gmra.mxu0 %v3352_v25 }
 0x152   :  { %4324 = vst [vmem:[#allocation31_spill] sm:$0xff] %v3546_v12  ;;  %v712_v36 = vpop.f32.mrf.mxu1 }
 0x153   :  { %4323 = vst [vmem:[#allocation30_spill] sm:$0xff] %v3544_v48 }
 0x155   :  { %2720 = vmatmul.msk.bf16.gmra.mxu3 %vm303_vm1, %v3279_v29  ;;  %1096 = vmatmul.bf16.gmra.mxu1 %v3249_v14 }
 0x158   :  { %v761_v45 = vpop.f32.mrf.mxu3 }
 0x159   :  { %v3553_v18 = vadd.f32 %v761_v45, %v712_v36  ;;  %v3555_v12 = vpop.f32.mrf.mxu2  ;;  %v3005_v36 = vld [vmem:[#allocation2 + $0x194] sm:$0xf]  ;;  %v2625_v45 = vld [vmem:[#allocation2 + $0x198] sm:$0xf0] }
 0x15a   :  { %4326 = vst [vmem:[#allocation33_spill] sm:$0xff] %v3555_v12  ;;  %v714_v5 = vpop.f32.mrf.mxu1  ;;  %v2628_v12 = vor.u32 %v3005_v36, %v2625_v45  ;;  %v1326_v45 = vld [vmem:[#allocation2 + $0x318] sm:$0x33]  ;;  %v2775_v36 = vld [vmem:[#allocation2 + $0x2a8] sm:$0xf] }
 0x15b   :  { %4325 = vst [vmem:[#allocation32_spill] sm:$0xff] %v3553_v18  ;;  %v3044_v18 = vld [vmem:[#allocation2 + $0x2cc] sm:$0xf0]  ;;  %v1400_v55 = vunpack.c.l.b16 %v1326_v45 }
 0x15c   :  { %1178 = vmatpush.bf16.msra.mxu0 %v2628_v12  ;;  %v3042_v12 = vld [vmem:[#allocation2 + $0x2bc] sm:$0xf0] }
 0x15e   :  { %2618 = vmatmul.msk.bf16.gmra.mxu2 %vm303_vm1, %v3330_v2  ;;  %v3577_v48 = vpop.f32.mrf.mxu0 }
 0x160   :  { %v763_v46 = vpop.f32.mrf.mxu3 }
 0x161   :  { %v3562_v52 = vadd.f32 %v763_v46, %v714_v5  ;;  %v3564_v23 = vpop.f32.mrf.mxu2  ;;  %1179 = vmatmul.bf16.vlgmr.msra.gmra.mxu0 %v3318_v49 }
 0x162   :  { %4328 = vst [vmem:[#allocation35_spill] sm:$0xff] %v3564_v23  ;;  %v717_v15 = vpop.f32.mrf.mxu1  ;;  %v2791_v23 = vld [vmem:[#allocation2 + $0x2c8] sm:$0xf] }
 0x163   :  { %4327 = vst [vmem:[#allocation34_spill] sm:$0xff] %v3562_v52  ;;  %v2792_v54 = vor.u32 %v3044_v18, %v2791_v23  ;;  %v2783_v52 = vld [vmem:[#allocation2 + $0x2b8] sm:$0xf] }
 0x165   :  { %2721 = vmatmul.msk.bf16.gmra.mxu3 %vm303_vm1, %v3300_v41  ;;  %1101 = vmatmul.bf16.gmra.mxu1 %v3270_v26 }
 0x166   :  { %1458 = vmatpush.bf16.msrb.mxu1 %v2792_v54  ;;  %v3590_v47 = vpop.f32.mrf.mxu0 }
 0x168   :  { %v766_v42 = vpop.f32.mrf.mxu3 }
 0x169   :  { %v3573_v5 = vadd.f32 %v766_v42, %v717_v15  ;;  %v3575_v46 = vpop.f32.mrf.mxu2  ;;  %v1401_v42 = vunpack.c.h.b16 %v1326_v45  ;;  %v2784_v15 = vor.u32 %v3042_v12, %v2783_v52  ;;  %v2823_v52 = vld [vmem:[#allocation2 + $0x308] sm:$0xf]  ;;  %v2793_v12 = vld [vmem:[#allocation2 + $0x2d0] sm:$0xf0] }
 0x16a   :  { %4330 = vst [vmem:[#allocation37_spill] sm:$0xff] %v3575_v46  ;;  %v719_v37 = vpop.f32.mrf.mxu1  ;;  %v1426_v46 = vpack.c.b16 %v1400_v55, %v1400_v55 }
 0x16b   :  { %4329 = vst [vmem:[#allocation36_spill] sm:$0xff] %v3573_v5  ;;  %v1427_v41 = vpack.c.b16 %v1401_v42, %v1401_v42  ;;  %1459 = vmatpush.bf16.msrb.mxu1 %v2784_v15  ;;  %v3040_v5 = vld [vmem:[#allocation2 + $0x2ac] sm:$0xf0]  ;;  %v3038_v15 = vld [vmem:[#allocation2 + $0x29c] sm:$0xf0] }
 0x16c   :  { %v1453_v54 = vsel %vm328_vm0, %v1426_v46, 0  ;;  %v2776_v45 = vor.u32 %v3040_v5, %v2775_v36  ;;  %v2767_v46 = vld [vmem:[#allocation2 + $0x298] sm:$0xf] }
 0x16d   :  { %v1456_v0 = vsel %vm328_vm0, %v1427_v41, 0  ;;  %1510 = vmatpush.bf16.msrb.mxu3 %v1453_v54  ;;  %v2768_v5 = vor.u32 %v3038_v15, %v2767_v46  ;;  %v2815_v36 = vld [vmem:[#allocation2 + $0x2f8] sm:$0xf]  ;;  %v3050_v54 = vld [vmem:[#allocation2 + $0x2fc] sm:$0xf0] }
 0x16e   :  { %2619 = vmatmul.msk.bf16.gmra.mxu2 %vm303_vm1, %v3362_v40  ;;  %v2816_v55 = vor.u32 %v3050_v54, %v2815_v36  ;;  %v3034_v15 = vld [vmem:[#allocation2 + $0x27c] sm:$0xf0]  ;;  %v2799_v36 = vld [vmem:[#allocation2 + $0x2d8] sm:$0xf] }
 0x16f   :  { %1608 = vmatpush.bf16.msra.mxu2 %v1456_v0  ;;  %1460 = vmatpush.bf16.msrb.mxu1 %v2776_v45  ;;  %v3046_v54 = vld [vmem:[#allocation2 + $0x2dc] sm:$0xf0] }
 0x170   :  { %v768_v22 = vpop.f32.mrf.mxu3 }
 0x171   :  { %v3584_v18 = vadd.f32 %v768_v22, %v719_v37  ;;  %v3586_v23 = vpop.f32.mrf.mxu2  ;;  %v3052_v22 = vld [vmem:[#allocation2 + $0x30c] sm:$0xf0]  ;;  %v3043_v37 = vld [vmem:[#allocation2 + $0x2cc] sm:$0xf]  ;;  %1184 = vmatmul.bf16.gmra.mxu0 %v3350_v24 }
 0x172   :  { %4332 = vst [vmem:[#allocation39_spill] sm:$0xff] %v3586_v23  ;;  %v722_v13 = vpop.f32.mrf.mxu1  ;;  %v2824_v42 = vor.u32 %v3052_v22, %v2823_v52  ;;  %v2796_v41 = vor.u32 %v3043_v37, %v2793_v12  ;;  %v2759_v52 = vld [vmem:[#allocation2 + $0x288] sm:$0xf]  ;;  %v3036_v22 = vld [vmem:[#allocation2 + $0x28c] sm:$0xf0]  ;;  %v3601_v23 = vpop.f32.mrf.mxu0 }
 0x173   :  { %4331 = vst [vmem:[#allocation38_spill] sm:$0xff] %v3584_v18  ;;  %1461 = vmatpush.bf16.msrb.mxu1 %v2768_v5  ;;  %v2760_v37 = vor.u32 %v3036_v22, %v2759_v52 }
 0x174   :  { %1511 = vmatpush.bf16.msrb.mxu3 %v2824_v42  ;;  %1556 = vmatpush.bf16.msrb.mxu0 %v2796_v41  ;;  %v2807_v42 = vld [vmem:[#allocation2 + $0x2e8] sm:$0xf]  ;;  %v3048_v41 = vld [vmem:[#allocation2 + $0x2ec] sm:$0xf0] }
 0x175   :  { %2722 = vmatmul.msk.bf16.gmra.mxu3 %vm303_vm1, %v3330_v2  ;;  %1106 = vmatmul.bf16.gmra.mxu1 %v3291_v35  ;;  %v2808_v46 = vor.u32 %v3048_v41, %v2807_v42  ;;  %v3032_v42 = vld [vmem:[#allocation2 + $0x26c] sm:$0xf0] }
 0x177   :  { %1462 = vmatpush.bf16.msrb.mxu1 %v2760_v37  ;;  %v2743_v37 = vld [vmem:[#allocation2 + $0x268] sm:$0xf] }
 0x178   :  { %v771_v0 = vpop.f32.mrf.mxu3  ;;  %1512 = vmatpush.bf16.msrb.mxu3 %v2816_v55 }
 0x179   :  { %v3597_v45 = vadd.f32 %v771_v0, %v722_v13  ;;  %v3599_v18 = vpop.f32.mrf.mxu2  ;;  %v2751_v13 = vld [vmem:[#allocation2 + $0x278] sm:$0xf]  ;;  %v2800_v0 = vor.u32 %v3046_v54, %v2799_v36  ;;  %v3030_v36 = vld [vmem:[#allocation2 + $0x25c] sm:$0xf0] }
 0x17a   :  { %v724_v32 = vpop.f32.mrf.mxu1  ;;  %v2752_v5 = vor.u32 %v3034_v15, %v2751_v13  ;;  %v3612_v12 = vpop.f32.mrf.mxu0  ;;  %v3041_v13 = vld [vmem:[#allocation2 + $0x2bc] sm:$0xf]  ;;  %v2785_v15 = vld [vmem:[#allocation2 + $0x2c0] sm:$0xf0] }
 0x17b   :  { %4333 = vst [vmem:[#allocation40_spill] sm:$0xff] %v3597_v45  ;;  %v2744_v45 = vor.u32 %v3032_v42, %v2743_v37 }
 0x17c   :  { %1513 = vmatpush.bf16.msrb.mxu3 %v2808_v46  ;;  %1463 = vmatpush.bf16.msrb.mxu1 %v2752_v5  ;;  %v2735_v5 = vld [vmem:[#allocation2 + $0x258] sm:$0xf]  ;;  %v3049_v46 = vld [vmem:[#allocation2 + $0x2fc] sm:$0xf] }
 0x17d   :  { %v2736_v54 = vor.u32 %v3030_v36, %v2735_v5 }
 0x17e   :  { %2620 = vmatmul.msk.bf16.gmra.mxu2 %vm303_vm1, %v3375_v56 }
 0x180   :  { %v773_v55 = vpop.f32.mrf.mxu3  ;;  %1514 = vmatpush.bf16.msrb.mxu3 %v2800_v0  ;;  %1464 = vmatpush.bf16.msrb.mxu1 %v2744_v45 }
 0x181   :  { %v3608_v52 = vadd.f32 %v773_v55, %v724_v32  ;;  %v3610_v22 = vpop.f32.mrf.mxu2  ;;  %v2788_v32 = vor.u32 %v3041_v13, %v2785_v15  ;;  %1189 = vmatmul.bf16.gmra.mxu0 %v3228_v1 }
 0x182   :  { %4335 = vst [vmem:[#allocation42_spill] sm:$0xff] %v3610_v22  ;;  %v727_v41 = vpop.f32.mrf.mxu1  ;;  %v3623_v45 = vpop.f32.mrf.mxu0 }
 0x183   :  { %4334 = vst [vmem:[#allocation41_spill] sm:$0xff] %v3608_v52  ;;  %1557 = vmatpush.bf16.msrb.mxu0 %v2788_v32  ;;  %v3051_v52 = vld [vmem:[#allocation2 + $0x30c] sm:$0xf]  ;;  %v3634_v32 = vadd.f32 %v3387_v61, %v3472_v10 }
 0x184   :  { %1465 = vmatpush.bf16.msrb.mxu1 %v2736_v54  ;;  %v2828_v22 = vor.u32 %v3051_v52, %v2825_v51 }
 0x185   :  { %2723 = vmatmul.msk.bf16.gmra.mxu3 %vm303_vm1, %v3362_v40  ;;  %1111 = vmatmul.bf16.gmra.mxu1 %v3321_v50 }
 0x186   :  { %1609 = vmatpush.bf16.msra.mxu2 %v2828_v22  ;;  %v3039_v22 = vld [vmem:[#allocation2 + $0x2ac] sm:$0xf] }
 0x188   :  { %v776_v55 = vpop.f32.mrf.mxu3 }
 0x189   :  { %v3619_v0 = vadd.f32 %v776_v55, %v727_v41  ;;  %v3621_v37 = vpop.f32.mrf.mxu2  ;;  %v2777_v55 = vld [vmem:[#allocation2 + $0x2b0] sm:$0xf0] }
 0x18a   :  { %v729_v42 = vpop.f32.mrf.mxu1  ;;  %v3639_v54 = vpop.f32.mrf.mxu0  ;;  %v2780_v61 = vor.u32 %v3039_v22, %v2777_v55 }
 0x18c   :  { %1558 = vmatpush.bf16.msrb.mxu0 %v2780_v61 }
 0x18e   :  { %2725 = vmatmul.msk.bf16.vlgmr.msrb.gmra.mxu2 %vm303_vm1, %v3216_v53 }
 0x190   :  { %v778_v13 = vpop.f32.mrf.mxu3 }
 0x191   :  { %v3630_v41 = vadd.f32 %v778_v13, %v729_v42  ;;  %v844_v15 = vpop.f32.mrf.mxu2  ;;  %v3652_v13 = vadd.f32 %v3392_v63, %v3481_v30  ;;  %1194 = vmatmul.bf16.gmra.mxu0 %v3249_v14 }
 0x192   :  { %v3637_v5 = vadd.f32 %v844_v15, %v3577_v48  ;;  %v732_v36 = vpop.f32.mrf.mxu1  ;;  %v3657_v52 = vpop.f32.mrf.mxu0 }
 0x193   :  { %4336 = vst [vmem:[#allocation43_spill] sm:$0xff] %v3630_v41 }
 0x195   :  { %2724 = vmatmul.msk.bf16.gmra.mxu3 %vm303_vm1, %v3375_v56  ;;  %1116 = vmatmul.bf16.gmra.mxu1 %v3352_v25 }
 0x198   :  { %v781_v10 = vpop.f32.mrf.mxu3 }
 0x199   :  { %v3648_v48 = vadd.f32 %v781_v10, %v732_v36  ;;  %v846_v42 = vpop.f32.mrf.mxu2 }
 0x19a   :  { %v3655_v15 = vadd.f32 %v846_v42, %v3590_v47  ;;  %v734_v51 = vpop.f32.mrf.mxu1  ;;  %v3670_v47 = vadd.f32 %v3399_v4, %v3490_v38  ;;  %v3675_v10 = vpop.f32.mrf.mxu0  ;;  %v2769_v38 = vld [vmem:[#allocation2 + $0x2a0] sm:$0xf0]  ;;  %v3686_v42 = vadd.f32 %v3404_v11, %v3500_v39  ;;  %v396_v11 = vadd.f32 %v3389_v62, %v3505_v44  ;;  %v3035_v44 = vld [vmem:[#allocation2 + $0x28c] sm:$0xf] }
 0x19c   :  { %v886_v39 = vmax.f32 %v396_v11, %v3509_v59 }
 0x19e   :  { %2726 = vmatmul.msk.bf16.gmra.mxu2 %vm303_vm1, %v3237_v8 }
 0x1a0   :  { %v783_v36 = vpop.f32.mrf.mxu3 }
 0x1a1   :  { %v3666_v63 = vadd.f32 %v783_v36, %v734_v51  ;;  %v849_v30 = vpop.f32.mrf.mxu2  ;;  %v2817_v51 = vld [vmem:[#allocation2 + $0x300] sm:$0xf0]  ;;  %v3037_v36 = vld [vmem:[#allocation2 + $0x29c] sm:$0xf]  ;;  %1199 = vmatmul.bf16.gmra.mxu0 %v3270_v26 }
 0x1a2   :  { %v3673_v55 = vadd.f32 %v849_v30, %v3601_v23  ;;  %v1082_v61 = vpop.f32.mrf.mxu1  ;;  %v2820_v4 = vor.u32 %v3049_v46, %v2817_v51  ;;  %v2772_v23 = vor.u32 %v3037_v36, %v2769_v38  ;;  %v3691_v7 = vpop.f32.mrf.mxu0  ;;  %v4338_v46 = vmax.f32 %v3496_v19, %v3498_v21 }
 0x1a3   :  { %4337 = vst [vmem:[#allocation44_spill] sm:$0xff] %v3666_v63  ;;  %v3708_v19 = vadd.f32 %v3411_v16, %v3511_v57 }
 0x1a4   :  { %1610 = vmatpush.bf16.msra.mxu2 %v2820_v4  ;;  %1559 = vmatpush.bf16.msrb.mxu0 %v2772_v23  ;;  %v2761_v23 = vld [vmem:[#allocation2 + $0x290] sm:$0xf0] }
 0x1a5   :  { %2829 = vmatmul.msk.bf16.vlgmr.msrb.gmra.mxu3 %vm303_vm1, %v3216_v53  ;;  %1466 = vmatmul.bf16.vlgmr.msrb.gmra.mxu1 %v3318_v49  ;;  %v2764_v16 = vor.u32 %v3035_v44, %v2761_v23  ;;  %v4340_v23 = vld [vmem:[#allocation12_spill] sm:$0xff] }
 0x1a8   :  { %v1131_v30 = vpop.f32.mrf.mxu3  ;;  %1560 = vmatpush.bf16.msrb.mxu0 %v2764_v16  ;;  %v3746_v16 = vadd.f32 %v4340_v23, %v3530_v43  ;;  %v4346_v23 = vld [vmem:[#allocation28_spill] sm:$0xff] }
 0x1a9   :  { %v1132_v41 = vadd.f32 %v1131_v30, %v1082_v61  ;;  %v851_v58 = vpop.f32.mrf.mxu2 }
 0x1aa   :  { %v3689_v22 = vadd.f32 %v851_v58, %v3612_v12  ;;  %v1084_v63 = vpop.f32.mrf.mxu1  ;;  %v3713_v4 = vpop.f32.mrf.mxu0 }
 0x1ab   :  { %v3696_v51 = vmax.f32 %v4338_v46, %v1132_v41 }
 0x1ae   :  { %2727 = vmatmul.msk.bf16.gmra.mxu2 %vm303_vm1, %v3258_v20 }
 0x1b0   :  { %v1133_v58 = vpop.f32.mrf.mxu3 }
 0x1b1   :  { %v1134_v12 = vadd.f32 %v1133_v58, %v1084_v63  ;;  %v854_v61 = vpop.f32.mrf.mxu2  ;;  %v3724_v63 = vadd.f32 %v3416_v31, %v3521_v33  ;;  %v4339_v58 = vmax.f32 %v3517_v17, %v3519_v28  ;;  %1204 = vmatmul.bf16.gmra.mxu0 %v3291_v35  ;;  %v401_v31 = vadd.f32 %v3401_v6, %v3566_v60  ;;  %v3033_v60 = vld [vmem:[#allocation2 + $0x27c] sm:$0xf] }
 0x1b2   :  { %v3711_v21 = vadd.f32 %v854_v61, %v3623_v45  ;;  %v1087_v41 = vpop.f32.mrf.mxu1  ;;  %v3729_v11 = vpop.f32.mrf.mxu0  ;;  %v3047_v61 = vld [vmem:[#allocation2 + $0x2ec] sm:$0xf] }
 0x1b3   :  { %v3715_v38 = vmax.f32 %v886_v39, %v1134_v12  ;;  %v890_v28 = vmax.f32 %v401_v31, %v3528_v3 }
 0x1b5   :  { %2830 = vmatmul.msk.bf16.gmra.mxu3 %vm303_vm1, %v3237_v8  ;;  %1471 = vmatmul.bf16.gmra.mxu1 %v3350_v24 }
 0x1b8   :  { %v1136_v59 = vpop.f32.mrf.mxu3 }
 0x1b9   :  { %v1137_v57 = vadd.f32 %v1136_v59, %v1087_v41  ;;  %v856_v45 = vpop.f32.mrf.mxu2  ;;  %v2809_v41 = vld [vmem:[#allocation2 + $0x2f0] sm:$0xf0] }
 0x1ba   :  { %v3727_v30 = vadd.f32 %v856_v45, %v3639_v54  ;;  %v1089_v46 = vpop.f32.mrf.mxu1  ;;  %v2812_v44 = vor.u32 %v3047_v61, %v2809_v41  ;;  %v3751_v45 = vpop.f32.mrf.mxu0  ;;  %v2753_v61 = vld [vmem:[#allocation2 + $0x280] sm:$0xf0]  ;;  %v4341_v41 = vld [vmem:[#allocation29_spill] sm:$0xff] }
 0x1bb   :  { %v3734_v39 = vmax.f32 %v4339_v58, %v1137_v57  ;;  %v2756_v3 = vor.u32 %v3033_v60, %v2753_v61 }
 0x1bc   :  { %1611 = vmatpush.bf16.msra.mxu2 %v2812_v44  ;;  %v4342_v44 = vld [vmem:[#allocation14_spill] sm:$0xff] }
 0x1bd   :  { %1561 = vmatpush.bf16.msrb.mxu0 %v2756_v3  ;;  %v3762_v31 = vadd.f32 %v4342_v44, %v4341_v41 }
 0x1be   :  { %2728 = vmatmul.msk.bf16.gmra.mxu2 %vm303_vm1, %v3279_v29 }
 0x1bf   :  { %4343 = vst [vmem:[#allocation12_spill] sm:$0xff] %v3762_v31  ;;  %v4362_v31 = vld [vmem:[#allocation32_spill] sm:$0xff] }
 0x1c0   :  { %v1138_v33 = vpop.f32.mrf.mxu3 }
 0x1c1   :  { %v1139_v17 = vadd.f32 %v1138_v33, %v1089_v46  ;;  %v859_v54 = vpop.f32.mrf.mxu2  ;;  %1209 = vmatmul.bf16.gmra.mxu0 %v3321_v50 }
 0x1c2   :  { %v3749_v59 = vadd.f32 %v859_v54, %v3657_v52  ;;  %v1092_v57 = vpop.f32.mrf.mxu1  ;;  %v4345_v54 = vld [vmem:[#allocation9_spill] sm:$0xff] }
 0x1c3   :  { %v3753_v58 = vmax.f32 %v890_v28, %v1139_v17  ;;  %v3767_v17 = vpop.f32.mrf.mxu0  ;;  %v4347_v6 = vmax.f32 %v4345_v54, %v4346_v23  ;;  %v4354_v54 = vld [vmem:[#allocation10_spill] sm:$0xff] }
 0x1c4   :  { %v4355_v23 = vld [vmem:[#allocation30_spill] sm:$0xff] }
 0x1c5   :  { %2831 = vmatmul.msk.bf16.gmra.mxu3 %vm303_vm1, %v3258_v20  ;;  %1476 = vmatmul.bf16.gmra.mxu1 %v3228_v1  ;;  %v4356_v60 = vmax.f32 %v4354_v54, %v4355_v23  ;;  %v4359_v23 = vld [vmem:[#allocation18_spill] sm:$0xff] }
 0x1c8   :  { %v1141_v43 = vpop.f32.mrf.mxu3 }
 0x1c9   :  { %v1142_v52 = vadd.f32 %v1141_v43, %v1092_v57  ;;  %v861_v46 = vpop.f32.mrf.mxu2  ;;  %v4349_v57 = vld [vmem:[#allocation8_spill] sm:$0xff]  ;;  %v4350_v43 = vld [vmem:[#allocation31_spill] sm:$0xff] }
 0x1ca   :  { %v3765_v33 = vadd.f32 %v861_v46, %v3675_v10  ;;  %v1094_v28 = vpop.f32.mrf.mxu1  ;;  %v4351_v46 = vld [vmem:[#allocation16_spill] sm:$0xff] }
 0x1cb   :  { %v3772_v12 = vmax.f32 %v4347_v6, %v1142_v52  ;;  %v3781_v41 = vadd.f32 %v4351_v46, %v4350_v43  ;;  %v3786_v52 = vpop.f32.mrf.mxu0  ;;  %v2801_v43 = vld [vmem:[#allocation2 + $0x2e0] sm:$0xf0] }
 0x1cc   :  { %4344 = vst [vmem:[#allocation29_spill] sm:$0xff] %v3765_v33  ;;  %v4361_v33 = vld [vmem:[#allocation11_spill] sm:$0xff] }
 0x1cd   :  { %4348 = vst [vmem:[#allocation14_spill] sm:$0xff] %v3772_v12 }
 0x1ce   :  { %2729 = vmatmul.msk.bf16.gmra.mxu2 %vm303_vm1, %v4349_v57  ;;  %4352 = vst [vmem:[#allocation9_spill] sm:$0xff] %v3781_v41 }
 0x1d0   :  { %v1143_v61 = vpop.f32.mrf.mxu3 }
 0x1d1   :  { %v1144_v3 = vadd.f32 %v1143_v61, %v1094_v28  ;;  %v864_v10 = vpop.f32.mrf.mxu2  ;;  %v3031_v28 = vld [vmem:[#allocation2 + $0x26c] sm:$0xf]  ;;  %v2745_v61 = vld [vmem:[#allocation2 + $0x270] sm:$0xf0]  ;;  %1214 = vmatmul.bf16.gmra.mxu0 %v3352_v25 }
 0x1d2   :  { %v3784_v44 = vadd.f32 %v864_v10, %v3691_v7  ;;  %v1097_v6 = vpop.f32.mrf.mxu1  ;;  %v2748_v7 = vor.u32 %v3031_v28, %v2745_v61  ;;  %v3045_v10 = vld [vmem:[#allocation2 + $0x2dc] sm:$0xf]  ;;  %v4363_v28 = vmax.f32 %v4361_v33, %v4362_v31 }
 0x1d3   :  { %v3791_v62 = vmax.f32 %v4356_v60, %v1144_v3  ;;  %v2804_v46 = vor.u32 %v3045_v10, %v2801_v43  ;;  %v4358_v3 = vld [vmem:[#allocation33_spill] sm:$0xff]  ;;  %v830_v41 = vpop.f32.mrf.mxu0  ;;  %v4366_v43 = vld [vmem:[#allocation19_spill] sm:$0xff] }
 0x1d4   :  { %4353 = vst [vmem:[#allocation28_spill] sm:$0xff] %v3784_v44  ;;  %1562 = vmatpush.bf16.msrb.mxu0 %v2748_v7  ;;  %v4375_v7 = vld [vmem:[#allocation15_spill] sm:$0xff] }
 0x1d5   :  { %4357 = vst [vmem:[#allocation8_spill] sm:$0xff] %v3791_v62  ;;  %2832 = vmatmul.msk.bf16.gmra.mxu3 %vm303_vm1, %v3279_v29  ;;  %1481 = vmatmul.bf16.gmra.mxu1 %v3249_v14  ;;  %v3800_v62 = vadd.f32 %v4359_v23, %v4358_v3  ;;  %v4370_v3 = vld [vmem:[#allocation34_spill] sm:$0xff] }
 0x1d6   :  { %1612 = vmatpush.bf16.msra.mxu2 %v2804_v46 }
 0x1d8   :  { %v1146_v12 = vpop.f32.mrf.mxu3 }
 0x1d9   :  { %v1147_v54 = vadd.f32 %v1146_v12, %v1097_v6  ;;  %v866_v60 = vpop.f32.mrf.mxu2 }
 0x1da   :  { %v3803_v36 = vadd.f32 %v866_v60, %v3713_v4  ;;  %v1099_v44 = vpop.f32.mrf.mxu1  ;;  %v4365_v4 = vld [vmem:[#allocation35_spill] sm:$0xff] }
 0x1db   :  { %v3808_v61 = vmax.f32 %v4363_v28, %v1147_v54  ;;  %v3817_v46 = vadd.f32 %v4366_v43, %v4365_v4  ;;  %v3822_v33 = vpop.f32.mrf.mxu0  ;;  %v4369_v54 = vld [vmem:[#allocation13_spill] sm:$0xff] }
 0x1dc   :  { %4360 = vst [vmem:[#allocation31_spill] sm:$0xff] %v3803_v36  ;;  %v4371_v23 = vmax.f32 %v4369_v54, %v4370_v3  ;;  %v4374_v36 = vld [vmem:[#allocation21_spill] sm:$0xff] }
 0x1dd   :  { %4364 = vst [vmem:[#allocation16_spill] sm:$0xff] %v3808_v61  ;;  %v4373_v61 = vld [vmem:[#allocation37_spill] sm:$0xff] }
 0x1de   :  { %2730 = vmatmul.msk.bf16.gmra.mxu2 %vm303_vm1, %v3330_v2  ;;  %4367 = vst [vmem:[#allocation10_spill] sm:$0xff] %v3817_v46  ;;  %v3836_v54 = vadd.f32 %v4374_v36, %v4373_v61  ;;  %v4378_v61 = vld [vmem:[#allocation39_spill] sm:$0xff] }
 0x1e0   :  { %v1148_v12 = vpop.f32.mrf.mxu3 }
 0x1e1   :  { %v1149_v6 = vadd.f32 %v1148_v12, %v1099_v44  ;;  %v869_v10 = vpop.f32.mrf.mxu2  ;;  %v3029_v44 = vld [vmem:[#allocation2 + $0x25c] sm:$0xf]  ;;  %v2737_v12 = vld [vmem:[#allocation2 + $0x260] sm:$0xf0] }
 0x1e2   :  { %v3820_v60 = vadd.f32 %v869_v10, %v3729_v11  ;;  %v1102_v31 = vpop.f32.mrf.mxu1  ;;  %v2740_v11 = vor.u32 %v3029_v44, %v2737_v12  ;;  %v4382_v44 = vld [vmem:[#allocation40_spill] sm:$0xff] }
 0x1e3   :  { %v3827_v28 = vmax.f32 %v4371_v23, %v1149_v6  ;;  %v1180_v23 = vpop.f32.mrf.mxu0 }
 0x1e4   :  { %4368 = vst [vmem:[#allocation30_spill] sm:$0xff] %v3820_v60  ;;  %1563 = vmatpush.bf16.msrb.mxu0 %v2740_v11  ;;  %v4376_v60 = vld [vmem:[#allocation36_spill] sm:$0xff] }
 0x1e5   :  { %4372 = vst [vmem:[#allocation33_spill] sm:$0xff] %v3827_v28  ;;  %2833 = vmatmul.msk.bf16.gmra.mxu3 %vm303_vm1, %v4349_v57  ;;  %1486 = vmatmul.bf16.gmra.mxu1 %v3270_v26  ;;  %v4377_v46 = vmax.f32 %v4375_v7, %v4376_v60  ;;  %v3060_v60 = vld [vmem:[%s4263_s3 + $0x38] sm:$0xff] }
 0x1e6   :  { %1904 = vmatpush.bf16.msra.mxu1 %v3060_v60 }
 0x1e7   :  { %1564 = vmatmul.bf16.vlgmr.msrb.gmra.mxu0 %v3318_v49 }
 0x1e8   :  { %v1151_v10 = vpop.f32.mrf.mxu3 }
 0x1e9   :  { %v1152_v4 = vadd.f32 %v1151_v10, %v1102_v31  ;;  %v871_v43 = vpop.f32.mrf.mxu2  ;;  %v4379_v31 = vld [vmem:[#allocation22_spill] sm:$0xff] }
 0x1ea   :  { %v3839_v6 = vadd.f32 %v871_v43, %v3751_v45  ;;  %v3841_v3 = vpop.f32.mrf.mxu1  ;;  %v3857_v12 = vadd.f32 %v4379_v31, %v4378_v61  ;;  %v4381_v43 = vld [vmem:[#allocation24_spill] sm:$0xff] }
 0x1eb   :  { %v3846_v28 = vmax.f32 %v4377_v46, %v1152_v4  ;;  %v3862_v46 = vpop.f32.mrf.mxu0  ;;  %v3871_v61 = vadd.f32 %v4381_v43, %v3599_v18 }
 0x1ee   :  { %2731 = vmatmul.msk.bf16.gmra.mxu2 %vm303_vm1, %v3362_v40 }
 0x1f0   :  { %v3853_v36 = vpop.f32.mrf.mxu3 }
 0x1f1   :  { %v874_v45 = vpop.f32.mrf.mxu2 }
 0x1f2   :  { %v3860_v11 = vadd.f32 %v874_v45, %v3767_v17  ;;  %v1107_v7 = vpop.f32.mrf.mxu1 }
 0x1f3   :  { %v3878_v31 = vpop.f32.mrf.mxu0 }
 0x1f4   :  { %4380 = vst [vmem:[#allocation18_spill] sm:$0xff] %v3860_v11  ;;  %v4383_v11 = vmax.f32 %v3445_v9, %v4382_v44  ;;  %v4386_v9 = vld [vmem:[#allocation42_spill] sm:$0xff]  ;;  %v4387_v44 = vld [vmem:[#allocation25_spill] sm:$0xff] }
 0x1f5   :  { %2834 = vmatmul.msk.bf16.gmra.mxu3 %vm303_vm1, %v3330_v2  ;;  %1491 = vmatmul.bf16.gmra.mxu1 %v3291_v35 }
 0x1f7   :  { %1569 = vmatmul.bf16.gmra.mxu0 %v3350_v24  ;;  %v3058_v24 = vld [vmem:[%s4263_s3 + $0x28] sm:$0xff] }
 0x1f8   :  { %v1156_v49 = vpop.f32.mrf.mxu3 }
 0x1f9   :  { %v1157_v10 = vadd.f32 %v1156_v49, %v1107_v7  ;;  %v876_v4 = vpop.f32.mrf.mxu2 }
 0x1fa   :  { %v3874_v17 = vadd.f32 %v876_v4, %v3786_v52  ;;  %v3876_v45 = vpop.f32.mrf.mxu1  ;;  %v3059_v52 = vld [vmem:[%s4263_s3 + $0x30] sm:$0xff] }
 0x1fb   :  { %v3886_v7 = vmax.f32 %v4383_v11, %v1157_v10  ;;  %1905 = vmatpush.bf16.msra.mxu1 %v3059_v52  ;;  %v3900_v11 = vadd.f32 %v4387_v44, %v4386_v9  ;;  %v1187_v43 = vpop.f32.mrf.mxu0  ;;  %v3068_v52 = vld [vmem:[%s4263_s3 + $0x78] sm:$0xff] }
 0x1fc   :  { %1953 = vmatpush.bf16.msra.mxu3 %v3068_v52  ;;  %v3056_v52 = vld [vmem:[%s4263_s3 + $0x18] sm:$0xff] }
 0x1fd   :  { %4384 = vst [vmem:[#allocation11_spill] sm:$0xff] %v3886_v7 }
 0x1fe   :  { %2732 = vmatmul.msk.bf16.gmra.mxu2 %vm303_vm1, %v3375_v56  ;;  %4388 = vst [vmem:[#allocation35_spill] sm:$0xff] %v3900_v11 }
 0x1ff   :  { %1906 = vmatpush.bf16.msra.mxu1 %v3058_v24  ;;  %v4390_v24 = vld [vmem:[#allocation27_spill] sm:$0xff] }
 0x200   :  { %v3896_v49 = vpop.f32.mrf.mxu3  ;;  %v3920_v18 = vadd.f32 %v4390_v24, %v3621_v37  ;;  %v3055_v37 = vld [vmem:[%s4263_s3 + $0x10] sm:$0xff] }
 0x201   :  { %4385 = vst [vmem:[#allocation32_spill] sm:$0xff] %v3896_v49  ;;  %v879_v4 = vpop.f32.mrf.mxu2  ;;  %v4391_v49 = vmax.f32 %v3458_v34, %v3619_v0 }
 0x202   :  { %v3902_v10 = vadd.f32 %v879_v4, %v830_v41  ;;  %v1112_v60 = vpop.f32.mrf.mxu1  ;;  %v3057_v41 = vld [vmem:[%s4263_s3 + $0x20] sm:$0xff] }
 0x203   :  { %1907 = vmatpush.bf16.msra.mxu1 %v3057_v41  ;;  %v1190_v7 = vpop.f32.mrf.mxu0 }
 0x204   :  { %4389 = vst [vmem:[#allocation19_spill] sm:$0xff] %v3902_v10 }
 0x205   :  { %2835 = vmatmul.msk.bf16.gmra.mxu3 %vm303_vm1, %v3362_v40  ;;  %1496 = vmatmul.bf16.gmra.mxu1 %v3321_v50 }
 0x207   :  { %1908 = vmatpush.bf16.msra.mxu1 %v3056_v52  ;;  %1574 = vmatmul.bf16.gmra.mxu0 %v3228_v1  ;;  %v4392_v1 = vmax.f32 %v3634_v32, %v3637_v5  ;;  %v3067_v32 = vld [vmem:[%s4263_s3 + $0x70] sm:$0xff] }
 0x208   :  { %v1161_v4 = vpop.f32.mrf.mxu3  ;;  %1954 = vmatpush.bf16.msra.mxu3 %v3067_v32 }
 0x209   :  { %v1162_v9 = vadd.f32 %v1161_v4, %v1112_v60  ;;  %v881_v44 = vpop.f32.mrf.mxu2 }
 0x20a   :  { %v3923_v10 = vadd.f32 %v881_v44, %v3822_v33  ;;  %v3925_v11 = vpop.f32.mrf.mxu1 }
 0x20b   :  { %v3933_v41 = vmax.f32 %v4391_v49, %v1162_v9  ;;  %1909 = vmatpush.bf16.msra.mxu1 %v3055_v37  ;;  %v1192_v49 = vpop.f32.mrf.mxu0  ;;  %v3054_v9 = vld [vmem:[%s4263_s3 + $0x8] sm:$0xff] }
 0x20c   :  { %v915_v60 = vmax.f32 %v3920_v18, %v3923_v10 }
 0x20e   :  { %2837 = vmatmul.msk.bf16.vlgmr.msra.gmra.mxu2 %vm303_vm1, %v3216_v53  ;;  %v3053_v53 = vld [vmem:[%s4263_s3] sm:$0xff] }
 0x20f   :  { %1910 = vmatpush.bf16.msra.mxu1 %v3054_v9 }
 0x210   :  { %v3943_v33 = vpop.f32.mrf.mxu3 }
 0x211   :  { %v1229_v4 = vpop.f32.mrf.mxu2 }
 0x212   :  { %v1230_v34 = vadd.f32 %v1229_v4, %v1180_v23  ;;  %v1117_v0 = vpop.f32.mrf.mxu1 }
 0x213   :  { %1911 = vmatpush.bf16.msra.mxu1 %v3053_v53  ;;  %v1195_v4 = vpop.f32.mrf.mxu0 }
 0x214   :  { %v3951_v44 = vmax.f32 %v4392_v1, %v1230_v34  ;;  %v4393_v34 = vmax.f32 %v3474_v27, %v3648_v48  ;;  %v4394_v1 = vmax.f32 %v3652_v13, %v3655_v15  ;;  %v4395_v48 = vmax.f32 %v3670_v47, %v3673_v55  ;;  %v3066_v13 = vld [vmem:[%s4263_s3 + $0x68] sm:$0xff] }
 0x215   :  { %2836 = vmatmul.msk.bf16.gmra.mxu3 %vm303_vm1, %v3375_v56  ;;  %1501 = vmatmul.bf16.gmra.mxu1 %v3352_v25  ;;  %v4396_v47 = vmax.f32 %v3686_v42, %v3689_v22 }
 0x216   :  { %1955 = vmatpush.bf16.msra.mxu3 %v3066_v13 }
 0x217   :  { %1579 = vmatmul.bf16.gmra.mxu0 %v3249_v14 }
 0x218   :  { %v1166_v23 = vpop.f32.mrf.mxu3 }
 0x219   :  { %v1167_v24 = vadd.f32 %v1166_v23, %v1117_v0  ;;  %v1231_v52 = vpop.f32.mrf.mxu2 }
 0x21a   :  { %v1232_v5 = vadd.f32 %v1231_v52, %v3862_v46  ;;  %v3963_v37 = vpop.f32.mrf.mxu1 }
 0x21b   :  { %v3968_v9 = vmax.f32 %v4393_v34, %v1167_v24  ;;  %v1197_v27 = vpop.f32.mrf.mxu0 }
 0x21c   :  { %v3973_v0 = vmax.f32 %v4394_v1, %v1232_v5 }
 0x21e   :  { %2838 = vmatmul.msk.bf16.gmra.mxu2 %vm303_vm1, %v3237_v8 }
 0x220   :  { %v3978_v46 = vpop.f32.mrf.mxu3 }
 0x221   :  { %v1234_v53 = vpop.f32.mrf.mxu2 }
 0x222   :  { %v1235_v23 = vadd.f32 %v1234_v53, %v3878_v31  ;;  %v1467_v52 = vpop.f32.mrf.mxu1  ;;  %v3994_v31 = vld [vmem:[%s4262_s2] sm:$0x3] }
 0x223   :  { %v3989_v5 = vpop.f32.mrf.mxu0  ;;  %v4006_v1 = vperm.slane %v3994_v31, 0 }
 0x224   :  { %v3984_v24 = vmax.f32 %v4395_v48, %v1235_v23 }
 0x227   :  { %1584 = vmatmul.bf16.gmra.mxu0 %v3270_v26  ;;  %v4397_v26 = vmax.f32 %v3708_v19, %v3711_v21  ;;  %v4398_v19 = vmax.f32 %v3724_v63, %v3727_v30  ;;  %v4399_v30 = vmax.f32 %v3746_v16, %v3749_v59  ;;  %v4400_v16 = vld [vmem:[#allocation12_spill] sm:$0xff]  ;;  %v4401_v59 = vld [vmem:[#allocation29_spill] sm:$0xff] }
 0x228   :  { %v1516_v14 = vpop.f32.mrf.mxu3 }
 0x229   :  { %v1236_v15 = vpop.f32.mrf.mxu2  ;;  %v1517_v34 = vadd.f32 %v1516_v14, %v1467_v52 }
 0x22a   :  { %v1237_v8 = vadd.f32 %v1236_v15, %v1187_v43  ;;  %v1469_v32 = vpop.f32.mrf.mxu1  ;;  %v3065_v15 = vld [vmem:[%s4263_s3 + $0x60] sm:$0xff] }
 0x22b   :  { %v1654_v43 = vmax.f32 %v3696_v51, %v1517_v34  ;;  %v4008_v14 = vpop.f32.mrf.mxu0  ;;  %1956 = vmatpush.bf16.msra.mxu3 %v3065_v15 }
 0x22c   :  { %v3999_v55 = vmax.f32 %v4396_v47, %v1237_v8 }
 0x22d   :  { %v1692_v22 = vadd.f32 %v4006_v1, %v1654_v43 }
 0x22e   :  { %2839 = vmatmul.msk.bf16.gmra.mxu2 %vm303_vm1, %v3258_v20 }
 0x22f   :  { %v1724_v8 = vmax.f32 %v1692_v22, 0.0 }
 0x230   :  { %v1518_v53 = vpop.f32.mrf.mxu3 }
 0x231   :  { %v1519_v23 = vadd.f32 %v1518_v53, %v1469_v32  ;;  %v1239_v52 = vpop.f32.mrf.mxu2 }
 0x232   :  { %v1240_v48 = vadd.f32 %v1239_v52, %v1190_v7  ;;  %v1472_v13 = vpop.f32.mrf.mxu1 }
 0x233   :  { %v1656_v42 = vmax.f32 %v3715_v38, %v1519_v23  ;;  %v1205_v38 = vpop.f32.mrf.mxu0 }
 0x234   :  { %v4015_v20 = vmax.f32 %v4397_v26, %v1240_v48 }
 0x235   :  { %v1694_v51 = vadd.f32 %v4006_v1, %v1656_v42 }
 0x237   :  { %v1726_v7 = vmax.f32 %v1694_v51, 0.0  ;;  %1589 = vmatmul.bf16.gmra.mxu0 %v3291_v35 }
 0x238   :  { %v1521_v32 = vpop.f32.mrf.mxu3 }
 0x239   :  { %v1756_v34 = vpack.c.bf16 %v1726_v7, %v1724_v8  ;;  %v1241_v47 = vpop.f32.mrf.mxu2  ;;  %v1522_v23 = vadd.f32 %v1521_v32, %v1472_v13 }
 0x23a   :  { %v1242_v43 = vadd.f32 %v1241_v47, %v1192_v49  ;;  %v1474_v53 = vpop.f32.mrf.mxu1 }
 0x23b   :  { %1912 = vmatmul.bf16.vlgmr.msra.gmra.mxu1 %v1756_v34  ;;  %v1658_v52 = vmax.f32 %v3734_v39, %v1522_v23  ;;  %v4030_v51 = vpop.f32.mrf.mxu0  ;;  %v3064_v39 = vld [vmem:[%s4263_s3 + $0x58] sm:$0xff] }
 0x23c   :  { %v4024_v21 = vmax.f32 %v4398_v19, %v1242_v43  ;;  %1957 = vmatpush.bf16.msra.mxu3 %v3064_v39  ;;  %v4403_v19 = vld [vmem:[#allocation14_spill] sm:$0xff] }
 0x23d   :  { %v1696_v13 = vadd.f32 %v4006_v1, %v1658_v52 }
 0x23e   :  { %2840 = vmatmul.msk.bf16.gmra.mxu2 %vm303_vm1, %v3279_v29 }
 0x23f   :  { %v1728_v15 = vmax.f32 %v1696_v13, 0.0  ;;  %v4404_v13 = vld [vmem:[#allocation8_spill] sm:$0xff] }
 0x240   :  { %v1523_v48 = vpop.f32.mrf.mxu3 }
 0x241   :  { %v1524_v22 = vadd.f32 %v1523_v48, %v1474_v53  ;;  %v1244_v42 = vpop.f32.mrf.mxu2  ;;  %v4402_v53 = vmax.f32 %v4400_v16, %v4401_v59  ;;  %v4408_v59 = vld [vmem:[#allocation31_spill] sm:$0xff] }
 0x242   :  { %v1245_v49 = vadd.f32 %v1244_v42, %v1195_v4  ;;  %v1477_v26 = vpop.f32.mrf.mxu1 }
 0x243   :  { %v1660_v63 = vmax.f32 %v3753_v58, %v1524_v22  ;;  %v1210_v43 = vpop.f32.mrf.mxu0 }
 0x244   :  { %v4037_v35 = vmax.f32 %v4399_v30, %v1245_v49  ;;  %v4405_v30 = vld [vmem:[#allocation9_spill] sm:$0xff] }
 0x245   :  { %v1698_v29 = vadd.f32 %v4006_v1, %v1660_v63 }
 0x247   :  { %v1730_v4 = vmax.f32 %v1698_v29, 0.0  ;;  %1594 = vmatmul.bf16.gmra.mxu0 %v3321_v50  ;;  %v4406_v29 = vld [vmem:[#allocation28_spill] sm:$0xff] }
 0x248   :  { %v1526_v8 = vpop.f32.mrf.mxu3  ;;  %v4407_v39 = vmax.f32 %v4405_v30, %v4406_v29  ;;  %v4413_v29 = vld [vmem:[#allocation30_spill] sm:$0xff] }
 0x249   :  { %v1246_v7 = vpop.f32.mrf.mxu2  ;;  %v1758_v32 = vpack.c.bf16 %v1730_v4, %v1728_v15  ;;  %v1527_v58 = vadd.f32 %v1526_v8, %v1477_v26 }
 0x24a   :  { %v1247_v34 = vadd.f32 %v1246_v7, %v1197_v27  ;;  %v1479_v47 = vpop.f32.mrf.mxu1  ;;  %v3063_v7 = vld [vmem:[%s4263_s3 + $0x50] sm:$0xff] }
 0x24b   :  { %1917 = vmatmul.bf16.gmra.mxu1 %v1758_v32  ;;  %v1662_v52 = vmax.f32 %v4403_v19, %v1527_v58  ;;  %1958 = vmatpush.bf16.msra.mxu3 %v3063_v7 }
 0x24c   :  { %v4046_v23 = vmax.f32 %v4402_v53, %v1247_v34  ;;  %v4409_v53 = vmax.f32 %v3800_v62, %v4408_v59  ;;  %v4412_v62 = vld [vmem:[#allocation10_spill] sm:$0xff] }
 0x24d   :  { %v1700_v26 = vadd.f32 %v4006_v1, %v1662_v52  ;;  %v4410_v52 = vld [vmem:[#allocation16_spill] sm:$0xff] }
 0x24e   :  { %2841 = vmatmul.msk.bf16.gmra.mxu2 %vm303_vm1, %v4349_v57  ;;  %v1212_v57 = vpop.f32.mrf.mxu0 }
 0x24f   :  { %v1732_v4 = vmax.f32 %v1700_v26, 0.0 }
 0x250   :  { %v1528_v48 = vpop.f32.mrf.mxu3 }
 0x251   :  { %v1529_v22 = vadd.f32 %v1528_v48, %v1479_v47  ;;  %v1249_v42 = vpop.f32.mrf.mxu2 }
 0x252   :  { %v1250_v27 = vadd.f32 %v1249_v42, %v3989_v5  ;;  %v1482_v49 = vpop.f32.mrf.mxu1 }
 0x253   :  { %v1664_v63 = vmax.f32 %v4404_v13, %v1529_v22 }
 0x254   :  { %v4058_v15 = vmax.f32 %v4407_v39, %v1250_v27  ;;  %v4414_v39 = vmax.f32 %v4412_v62, %v4413_v29 }
 0x255   :  { %v1702_v50 = vadd.f32 %v4006_v1, %v1664_v63  ;;  %v4411_v63 = vld [vmem:[#allocation33_spill] sm:$0xff] }
 0x256   :  { %v1215_v22 = vpop.f32.mrf.mxu0 }
 0x257   :  { %v1734_v8 = vmax.f32 %v1702_v50, 0.0  ;;  %1599 = vmatmul.bf16.gmra.mxu0 %v3352_v25 }
 0x258   :  { %v1531_v5 = vpop.f32.mrf.mxu3 }
 0x259   :  { %v1251_v32 = vpop.f32.mrf.mxu2  ;;  %v1760_v34 = vpack.c.bf16 %v1734_v8, %v1732_v4  ;;  %v1532_v16 = vadd.f32 %v1531_v5, %v1482_v49  ;;  %v3062_v8 = vld [vmem:[%s4263_s3 + $0x48] sm:$0xff] }
 0x25a   :  { %v1252_v47 = vadd.f32 %v1251_v32, %v4008_v14  ;;  %v1484_v58 = vpop.f32.mrf.mxu1  ;;  %1959 = vmatpush.bf16.msra.mxu3 %v3062_v8 }
 0x25b   :  { %1922 = vmatmul.bf16.gmra.mxu1 %v1760_v34  ;;  %v1666_v48 = vmax.f32 %v4410_v52, %v1532_v16  ;;  %v4415_v16 = vmax.f32 %v3836_v54, %v3839_v6 }
 0x25c   :  { %v4068_v19 = vmax.f32 %v4409_v53, %v1252_v47  ;;  %v1154_v53 = vadd.f32 %v3853_v36, %v3841_v3  ;;  %v4419_v3 = vld [vmem:[#allocation18_spill] sm:$0xff] }
 0x25d   :  { %v1704_v49 = vadd.f32 %v4006_v1, %v1666_v48  ;;  %v4420_v36 = vmax.f32 %v3857_v12, %v4419_v3  ;;  %v4421_v12 = vmax.f32 %v3871_v61, %v3874_v17 }
 0x25e   :  { %2842 = vmatmul.msk.bf16.gmra.mxu2 %vm303_vm1, %v3330_v2  ;;  %v1217_v32 = vpop.f32.mrf.mxu0 }
 0x25f   :  { %v1736_v2 = vmax.f32 %v1704_v49, 0.0 }
 0x260   :  { %v1533_v42 = vpop.f32.mrf.mxu3 }
 0x261   :  { %v1534_v27 = vadd.f32 %v1533_v42, %v1484_v58  ;;  %v1254_v26 = vpop.f32.mrf.mxu2  ;;  %v4416_v42 = vld [vmem:[#allocation17_spill] sm:$0xff] }
 0x262   :  { %v1255_v14 = vadd.f32 %v1254_v26, %v1205_v38  ;;  %v1487_v13 = vpop.f32.mrf.mxu1 }
 0x263   :  { %v1668_v30 = vmax.f32 %v4411_v63, %v1534_v27  ;;  %v4417_v27 = vld [vmem:[#allocation38_spill] sm:$0xff] }
 0x264   :  { %v4079_v50 = vmax.f32 %v4414_v39, %v1255_v14 }
 0x265   :  { %v1706_v25 = vadd.f32 %v4006_v1, %v1668_v30 }
 0x266   :  { %v1565_v30 = vpop.f32.mrf.mxu0 }
 0x267   :  { %v1738_v4 = vmax.f32 %v1706_v25, 0.0  ;;  %v3061_v25 = vld [vmem:[%s4263_s3 + $0x40] sm:$0xff] }
 0x268   :  { %v1536_v7 = vpop.f32.mrf.mxu3  ;;  %1960 = vmatpush.bf16.msra.mxu3 %v3061_v25 }
 0x269   :  { %v1256_v38 = vpop.f32.mrf.mxu2  ;;  %v1762_v5 = vpack.c.bf16 %v1738_v4, %v1736_v2  ;;  %v1537_v58 = vadd.f32 %v1536_v7, %v1487_v13 }
 0x26a   :  { %v1257_v34 = vadd.f32 %v1256_v38, %v4030_v51  ;;  %v1489_v47 = vpop.f32.mrf.mxu1  ;;  %v4418_v51 = vmax.f32 %v4416_v42, %v4417_v27 }
 0x26b   :  { %1927 = vmatmul.bf16.gmra.mxu1 %v1762_v5  ;;  %v1670_v52 = vmax.f32 %v3846_v28, %v1537_v58  ;;  %v4422_v5 = vld [vmem:[#allocation32_spill] sm:$0xff]  ;;  %v4423_v58 = vld [vmem:[#allocation11_spill] sm:$0xff] }
 0x26c   :  { %v4089_v59 = vmax.f32 %v4415_v16, %v1257_v34  ;;  %v1287_v26 = vmax.f32 %v4418_v51, %v1154_v53  ;;  %v1159_v34 = vadd.f32 %v4422_v5, %v3876_v45  ;;  %v4428_v45 = vld [vmem:[#allocation19_spill] sm:$0xff] }
 0x26d   :  { %v1708_v54 = vadd.f32 %v4006_v1, %v1670_v52  ;;  %v4425_v52 = vld [vmem:[#allocation41_spill] sm:$0xff] }
 0x26e   :  { %2843 = vmatmul.msk.bf16.gmra.mxu2 %vm303_vm1, %v3362_v40 }
 0x26f   :  { %v1740_v28 = vmax.f32 %v1708_v54, 0.0 }
 0x270   :  { %v1538_v48 = vpop.f32.mrf.mxu3 }
 0x271   :  { %v1539_v14 = vadd.f32 %v1538_v48, %v1489_v47  ;;  %v1259_v13 = vpop.f32.mrf.mxu2  ;;  %v1567_v47 = vpop.f32.mrf.mxu0 }
 0x272   :  { %v1260_v49 = vadd.f32 %v1259_v13, %v1210_v43  ;;  %v1492_v63 = vpop.f32.mrf.mxu1  ;;  %v4427_v13 = vld [vmem:[#allocation35_spill] sm:$0xff] }
 0x273   :  { %v1672_v6 = vmax.f32 %v1287_v26, %v1539_v14 }
 0x274   :  { %v4103_v62 = vmax.f32 %v4420_v36, %v1260_v49  ;;  %v4429_v49 = vmax.f32 %v4427_v13, %v4428_v45 }
 0x275   :  { %v1710_v40 = vadd.f32 %v4006_v1, %v1672_v6 }
 0x277   :  { %v1742_v29 = vmax.f32 %v1710_v40, 0.0 }
 0x278   :  { %v1541_v39 = vpop.f32.mrf.mxu3 }
 0x279   :  { %v1261_v43 = vpop.f32.mrf.mxu2  ;;  %v1764_v2 = vpack.c.bf16 %v1742_v29, %v1740_v28  ;;  %v1542_v7 = vadd.f32 %v1541_v39, %v1492_v63  ;;  %v1570_v3 = vpop.f32.mrf.mxu0 }
 0x27a   :  { %v1262_v4 = vadd.f32 %v1261_v43, %v1212_v57  ;;  %v1494_v8 = vpop.f32.mrf.mxu1  ;;  %v4424_v57 = vld [vmem:[#allocation20_spill] sm:$0xff]  ;;  %v1164_v43 = vadd.f32 %v3943_v33, %v3925_v11 }
 0x27b   :  { %1932 = vmatmul.bf16.gmra.mxu1 %v1764_v2  ;;  %v1674_v16 = vmax.f32 %v4423_v58, %v1542_v7  ;;  %v4426_v48 = vmax.f32 %v4424_v57, %v4425_v52  ;;  %v4431_v7 = vld [vmem:[#allocation43_spill] sm:$0xff] }
 0x27c   :  { %v4112_v38 = vmax.f32 %v4421_v12, %v1262_v4 }
 0x27d   :  { %v1291_v42 = vmax.f32 %v4426_v48, %v1159_v34  ;;  %v1712_v17 = vadd.f32 %v4006_v1, %v1674_v16  ;;  %v3076_v48 = vld [vmem:[%s4265_s5 + $0x38] sm:$0xff] }
 0x27e   :  { %2844 = vmatmul.msk.bf16.gmra.mxu2 %vm303_vm1, %v3375_v56  ;;  %2094 = vmatpush.bf16.msra.mxu0 %v3076_v48 }
 0x27f   :  { %v1744_v54 = vmax.f32 %v1712_v17, 0.0 }
 0x280   :  { %v1543_v53 = vpop.f32.mrf.mxu3 }
 0x281   :  { %v1544_v27 = vadd.f32 %v1543_v53, %v1494_v8  ;;  %v1264_v51 = vpop.f32.mrf.mxu2  ;;  %v4430_v8 = vld [vmem:[#allocation23_spill] sm:$0xff]  ;;  %v1572_v58 = vpop.f32.mrf.mxu0 }
 0x282   :  { %v1265_v26 = vadd.f32 %v1264_v51, %v1215_v22  ;;  %v1497_v61 = vpop.f32.mrf.mxu1  ;;  %v4432_v12 = vmax.f32 %v4430_v8, %v4431_v7 }
 0x283   :  { %v1676_v14 = vmax.f32 %v1291_v42, %v1544_v27 }
 0x284   :  { %v4126_v63 = vmax.f32 %v4429_v49, %v1265_v26  ;;  %v1295_v5 = vmax.f32 %v4432_v12, %v1164_v43 }
 0x285   :  { %v1714_v56 = vadd.f32 %v4006_v1, %v1676_v14 }
 0x287   :  { %v1746_v6 = vmax.f32 %v1714_v56, 0.0 }
 0x288   :  { %v1546_v36 = vpop.f32.mrf.mxu3 }
 0x289   :  { %v1266_v40 = vpop.f32.mrf.mxu2  ;;  %v1766_v28 = vpack.c.bf16 %v1746_v6, %v1744_v54  ;;  %v1547_v22 = vadd.f32 %v1546_v36, %v1497_v61  ;;  %v1575_v26 = vpop.f32.mrf.mxu0  ;;  %v4434_v54 = vld [vmem:[#allocation44_spill] sm:$0xff] }
 0x28a   :  { %v1267_v29 = vadd.f32 %v1266_v40, %v1217_v32  ;;  %v1499_v39 = vpop.f32.mrf.mxu1 }
 0x28b   :  { %1937 = vmatmul.bf16.gmra.mxu1 %v1766_v28  ;;  %v1678_v2 = vmax.f32 %v3933_v41, %v1547_v22  ;;  %v4144_v41 = vperm.slane %v3994_v31, 1 }
 0x28c   :  { %v4132_v25 = vmax.f32 %v915_v60, %v1267_v29 }
 0x28d   :  { %v1716_v16 = vadd.f32 %v4006_v1, %v1678_v2 }
 0x28f   :  { %v1748_v60 = vmax.f32 %v1716_v16, 0.0 }
 0x290   :  { %v1548_v4 = vpop.f32.mrf.mxu3 }
 0x291   :  { %v1549_v34 = vadd.f32 %v1548_v4, %v1499_v39  ;;  %v1614_v32 = vpop.f32.mrf.mxu2  ;;  %v3075_v4 = vld [vmem:[%s4265_s5 + $0x30] sm:$0xff] }
 0x292   :  { %v1615_v57 = vadd.f32 %v1614_v32, %v1565_v30  ;;  %v1502_v18 = vpop.f32.mrf.mxu1  ;;  %2095 = vmatpush.bf16.msra.mxu0 %v3075_v4 }
 0x293   :  { %v1680_v53 = vmax.f32 %v1295_v5, %v1549_v34 }
 0x294   :  { %v1655_v11 = vmax.f32 %v3951_v44, %v1615_v57  ;;  %v1169_v44 = vadd.f32 %v3978_v46, %v3963_v37  ;;  %v1577_v46 = vpop.f32.mrf.mxu0 }
 0x295   :  { %v1718_v10 = vadd.f32 %v4006_v1, %v1680_v53 }
 0x296   :  { %v1693_v61 = vadd.f32 %v4144_v41, %v1655_v11 }
 0x297   :  { %v1750_v52 = vmax.f32 %v1718_v10, 0.0 }
 0x298   :  { %v1551_v33 = vpop.f32.mrf.mxu3  ;;  %v1725_v45 = vmax.f32 %v1693_v61, 0.0  ;;  %v3073_v61 = vld [vmem:[%s4265_s5 + $0x20] sm:$0xff] }
 0x299   :  { %v1616_v42 = vpop.f32.mrf.mxu2  ;;  %v1768_v27 = vpack.c.bf16 %v1750_v52, %v1748_v60  ;;  %v1552_v30 = vadd.f32 %v1551_v33, %v1502_v18 }
 0x29a   :  { %v1617_v51 = vadd.f32 %v1616_v42, %v1567_v47  ;;  %v1504_v14 = vpop.f32.mrf.mxu1  ;;  %v4433_v47 = vld [vmem:[#allocation26_spill] sm:$0xff] }
 0x29b   :  { %1942 = vmatmul.bf16.gmra.mxu1 %v1768_v27  ;;  %v1682_v13 = vmax.f32 %v3968_v9, %v1552_v30  ;;  %v4435_v6 = vmax.f32 %v4433_v47, %v4434_v54 }
 0x29c   :  { %v1657_v17 = vmax.f32 %v3973_v0, %v1617_v51  ;;  %v1580_v34 = vpop.f32.mrf.mxu0 }
 0x29d   :  { %v1299_v36 = vmax.f32 %v4435_v6, %v1169_v44  ;;  %v1720_v0 = vadd.f32 %v4006_v1, %v1682_v13 }
 0x29e   :  { %v1695_v31 = vadd.f32 %v4144_v41, %v1657_v17 }
 0x29f   :  { %v1752_v43 = vmax.f32 %v1720_v0, 0.0 }
 0x2a0   :  { %v1727_v49 = vmax.f32 %v1695_v31, 0.0  ;;  %v1553_v56 = vpop.f32.mrf.mxu3 }
 0x2a1   :  { %v1554_v40 = vadd.f32 %v1553_v56, %v1504_v14  ;;  %v1619_v28 = vpop.f32.mrf.mxu2 }
 0x2a2   :  { %v1757_v29 = vpack.c.bf16 %v1727_v49, %v1725_v45  ;;  %v1620_v22 = vadd.f32 %v1619_v28, %v1570_v3 }
 0x2a3   :  { %v1684_v39 = vmax.f32 %v1299_v36, %v1554_v40  ;;  %v3072_v36 = vld [vmem:[%s4265_s5 + $0x18] sm:$0xff] }
 0x2a4   :  { %1961 = vmatmul.bf16.vlgmr.msra.gmra.mxu3 %v1757_v29  ;;  %v1659_v2 = vmax.f32 %v3984_v24, %v1620_v22  ;;  %v1582_v60 = vpop.f32.mrf.mxu0 }
 0x2a5   :  { %v1722_v37 = vadd.f32 %v4006_v1, %v1684_v39 }
 0x2a6   :  { %v1697_v5 = vadd.f32 %v4144_v41, %v1659_v2  ;;  %v3071_v2 = vld [vmem:[%s4265_s5 + $0x10] sm:$0xff] }
 0x2a7   :  { %v1754_v9 = vmax.f32 %v1722_v37, 0.0 }
 0x2a8   :  { %v1729_v32 = vmax.f32 %v1697_v5, 0.0 }
 0x2a9   :  { %v1621_v8 = vpop.f32.mrf.mxu2  ;;  %v1770_v7 = vpack.c.bf16 %v1754_v9, %v1752_v43 }
 0x2aa   :  { %v1622_v12 = vadd.f32 %v1621_v8, %v1572_v58  ;;  %v3074_v58 = vld [vmem:[%s4265_s5 + $0x28] sm:$0xff] }
 0x2ab   :  { %1947 = vmatmul.bf16.gmra.mxu1 %v1770_v7  ;;  %2096 = vmatpush.bf16.msra.mxu0 %v3074_v58 }
 0x2ac   :  { %v1661_v3 = vmax.f32 %v3999_v55, %v1622_v12  ;;  %v1585_v30 = vpop.f32.mrf.mxu0 }
 0x2ae   :  { %v1699_v1 = vadd.f32 %v4144_v41, %v1661_v3 }
 0x2af   :  { %2097 = vmatpush.bf16.msra.mxu0 %v3073_v61 }
 0x2b0   :  { %v1731_v16 = vmax.f32 %v1699_v1, 0.0 }
 0x2b1   :  { %v1624_v53 = vpop.f32.mrf.mxu2 }
 0x2b2   :  { %v1759_v24 = vpack.c.bf16 %v1731_v16, %v1729_v32  ;;  %v1625_v57 = vadd.f32 %v1624_v53, %v1575_v26 }
 0x2b3   :  { %2098 = vmatpush.bf16.msra.mxu0 %v3072_v36 }
 0x2b4   :  { %1966 = vmatmul.bf16.gmra.mxu3 %v1759_v24  ;;  %v1663_v18 = vmax.f32 %v4015_v20, %v1625_v57  ;;  %v1587_v14 = vpop.f32.mrf.mxu0 }
 0x2b6   :  { %v1701_v55 = vadd.f32 %v4144_v41, %v1663_v18 }
 0x2b7   :  { %2099 = vmatpush.bf16.msra.mxu0 %v3071_v2 }
 0x2b8   :  { %v1733_v48 = vmax.f32 %v1701_v55, 0.0 }
 0x2b9   :  { %v1626_v10 = vpop.f32.mrf.mxu2 }
 0x2ba   :  { %v1627_v52 = vadd.f32 %v1626_v10, %v1577_v46 }
 0x2bc   :  { %v1665_v11 = vmax.f32 %v4024_v21, %v1627_v52 }
 0x2be   :  { %v1703_v33 = vadd.f32 %v4144_v41, %v1665_v11 }
 0x2c0   :  { %v1735_v42 = vmax.f32 %v1703_v33, 0.0  ;;  %v3069_v33 = vld [vmem:[%s4265_s5] sm:$0xff] }
 0x2c1   :  { %v1629_v27 = vpop.f32.mrf.mxu2 }
 0x2c2   :  { %v1761_v51 = vpack.c.bf16 %v1735_v42, %v1733_v48  ;;  %v1630_v20 = vadd.f32 %v1629_v27, %v1580_v34 }
 0x2c4   :  { %1971 = vmatmul.bf16.gmra.mxu3 %v1761_v51  ;;  %v1667_v26 = vmax.f32 %v4037_v35, %v1630_v20  ;;  %v1590_v35 = vpop.f32.mrf.mxu0 }
 0x2c6   :  { %v1705_v21 = vadd.f32 %v4144_v41, %v1667_v26 }
 0x2c8   :  { %v1737_v45 = vmax.f32 %v1705_v21, 0.0 }
 0x2c9   :  { %v1631_v17 = vpop.f32.mrf.mxu2 }
 0x2ca   :  { %v1632_v44 = vadd.f32 %v1631_v17, %v1582_v60 }
 0x2cc   :  { %v1669_v31 = vmax.f32 %v4046_v23, %v1632_v44  ;;  %v1592_v37 = vpop.f32.mrf.mxu0 }
 0x2ce   :  { %v1707_v13 = vadd.f32 %v4144_v41, %v1669_v31 }
 0x2d0   :  { %v1739_v49 = vmax.f32 %v1707_v13, 0.0 }
 0x2d1   :  { %v1634_v56 = vpop.f32.mrf.mxu2 }
 0x2d2   :  { %v1763_v47 = vpack.c.bf16 %v1739_v49, %v1737_v45  ;;  %v1635_v54 = vadd.f32 %v1634_v56, %v1585_v30 }
 0x2d4   :  { %1976 = vmatmul.bf16.gmra.mxu3 %v1763_v47  ;;  %v1671_v6 = vmax.f32 %v4058_v15, %v1635_v54  ;;  %v1595_v7 = vpop.f32.mrf.mxu0 }
 0x2d6   :  { %v1709_v23 = vadd.f32 %v4144_v41, %v1671_v6 }
 0x2d8   :  { %v1741_v39 = vmax.f32 %v1709_v23, 0.0 }
 0x2d9   :  { %v1636_v40 = vpop.f32.mrf.mxu2 }
 0x2da   :  { %v1637_v28 = vadd.f32 %v1636_v40, %v1587_v14 }
 0x2dc   :  { %v1673_v29 = vmax.f32 %v4068_v19, %v1637_v28  ;;  %v1597_v53 = vpop.f32.mrf.mxu0 }
 0x2de   :  { %v1711_v0 = vadd.f32 %v4144_v41, %v1673_v29 }
 0x2e0   :  { %v1743_v22 = vmax.f32 %v1711_v0, 0.0 }
 0x2e1   :  { %v1639_v46 = vpop.f32.mrf.mxu2 }
 0x2e2   :  { %v1765_v43 = vpack.c.bf16 %v1743_v22, %v1741_v39  ;;  %v1640_v9 = vadd.f32 %v1639_v46, %v1590_v35 }
 0x2e4   :  { %1981 = vmatmul.bf16.gmra.mxu3 %v1765_v43  ;;  %v1675_v15 = vmax.f32 %v4079_v50, %v1640_v9  ;;  %v3070_v50 = vld [vmem:[%s4265_s5 + $0x8] sm:$0xff]  ;;  %v1600_v60 = vpop.f32.mrf.mxu0 }
 0x2e5   :  { %2100 = vmatpush.bf16.msra.mxu0 %v3070_v50 }
 0x2e6   :  { %v1713_v19 = vadd.f32 %v4144_v41, %v1675_v15 }
 0x2e8   :  { %v1745_v3 = vmax.f32 %v1713_v19, 0.0 }
 0x2e9   :  { %v1641_v4 = vpop.f32.mrf.mxu2  ;;  %2101 = vmatpush.bf16.msra.mxu0 %v3069_v33 }
 0x2ea   :  { %v1642_v8 = vadd.f32 %v1641_v4, %v1592_v37 }
 0x2ec   :  { %v1677_v12 = vmax.f32 %v4089_v59, %v1642_v8  ;;  %v1602_v51 = vpop.f32.mrf.mxu0 }
 0x2ee   :  { %v1715_v5 = vadd.f32 %v4144_v41, %v1677_v12 }
 0x2f0   :  { %v1747_v1 = vmax.f32 %v1715_v5, 0.0 }
 0x2f1   :  { %v1644_v34 = vpop.f32.mrf.mxu2 }
 0x2f2   :  { %v1767_v32 = vpack.c.bf16 %v1747_v1, %v1745_v3  ;;  %v1645_v16 = vadd.f32 %v1644_v34, %v1595_v7 }
 0x2f4   :  { %1986 = vmatmul.bf16.gmra.mxu3 %v1767_v32  ;;  %v1679_v24 = vmax.f32 %v4103_v62, %v1645_v16  ;;  %v1913_v62 = vpop.f32.mrf.mxu1 }
 0x2f6   :  { %v1717_v59 = vadd.f32 %v4144_v41, %v1679_v24 }
 0x2f8   :  { %v1749_v52 = vmax.f32 %v1717_v59, 0.0 }
 0x2f9   :  { %v1646_v57 = vpop.f32.mrf.mxu2 }
 0x2fa   :  { %v1647_v18 = vadd.f32 %v1646_v57, %v1597_v53 }
 0x2fc   :  { %v1681_v58 = vmax.f32 %v4112_v38, %v1647_v18  ;;  %v1915_v17 = vpop.f32.mrf.mxu1 }
 0x2fe   :  { %v1719_v10 = vadd.f32 %v4144_v41, %v1681_v58 }
 0x300   :  { %v1751_v55 = vmax.f32 %v1719_v10, 0.0 }
 0x301   :  { %v1649_v11 = vpop.f32.mrf.mxu2 }
 0x302   :  { %v1769_v48 = vpack.c.bf16 %v1751_v55, %v1749_v52  ;;  %v1650_v42 = vadd.f32 %v1649_v11, %v1600_v60 }
 0x304   :  { %1991 = vmatmul.bf16.gmra.mxu3 %v1769_v48  ;;  %v1683_v27 = vmax.f32 %v4126_v63, %v1650_v42  ;;  %v1918_v14 = vpop.f32.mrf.mxu1  ;;  %v4212_v63 = vld [vmem:[%s4264_s4] ss:$0 sm:$0xff] }
 0x305   :  { %v1914_v49 = vadd.f32 %v4212_v63, %v1913_v62  ;;  %v1919_v23 = vadd.f32 %v4212_v63, %v1918_v14 }
 0x306   :  { %v1721_v20 = vadd.f32 %v4144_v41, %v1683_v27 }
 0x308   :  { %v1753_v44 = vmax.f32 %v1721_v20, 0.0 }
 0x309   :  { %v1651_v30 = vpop.f32.mrf.mxu2 }
 0x30a   :  { %v1652_v38 = vadd.f32 %v1651_v30, %v1602_v51 }
 0x30c   :  { %v1685_v26 = vmax.f32 %v4132_v25, %v1652_v38  ;;  %v1920_v13 = vpop.f32.mrf.mxu1  ;;  %v1916_v25 = vadd.f32 %v4212_v63, %v1915_v17 }
 0x30d   :  { %v1921_v29 = vadd.f32 %v4212_v63, %v1920_v13 }
 0x30e   :  { %v1723_v61 = vadd.f32 %v4144_v41, %v1685_v26 }
 0x310   :  { %v1755_v21 = vmax.f32 %v1723_v61, 0.0 }
 0x312   :  { %v1771_v31 = vpack.c.bf16 %v1755_v21, %v1753_v44 }
 0x314   :  { %1996 = vmatmul.bf16.gmra.mxu3 %v1771_v31  ;;  %v1923_v56 = vpop.f32.mrf.mxu1 }
 0x315   :  { %v1924_v4 = vadd.f32 %v4212_v63, %v1923_v56 }
 0x31c   :  { %v1925_v40 = vpop.f32.mrf.mxu1 }
 0x31d   :  { %v1926_v8 = vadd.f32 %v4212_v63, %v1925_v40 }
 0x324   :  { %v1928_v37 = vpop.f32.mrf.mxu1 }
 0x325   :  { %v1929_v16 = vadd.f32 %v4212_v63, %v1928_v37 }
 0x327   :  { %v1962_v45 = vpop.f32.mrf.mxu3 }
 0x328   :  { %v1963_v47 = vadd.f32 %v1962_v45, %v1914_v49 }
 0x32a   :  { %v2002_v35 = vmax.f32 %v1963_v47, 0.0 }
 0x32c   :  { %v1930_v2 = vpop.f32.mrf.mxu1 }
 0x32d   :  { %v1931_v50 = vadd.f32 %v4212_v63, %v1930_v2 }
 0x32f   :  { %v1964_v41 = vpop.f32.mrf.mxu3 }
 0x330   :  { %v1965_v54 = vadd.f32 %v1964_v41, %v1916_v25 }
 0x332   :  { %v2003_v6 = vmax.f32 %v1965_v54, 0.0 }
 0x334   :  { %v2018_v36 = vpack.c.bf16 %v2003_v6, %v2002_v35  ;;  %v1933_v34 = vpop.f32.mrf.mxu1 }
 0x335   :  { %v1934_v55 = vadd.f32 %v4212_v63, %v1933_v34  ;;  %v3151_v34 = vmov 0  }
 0x336   :  { %2102 = vmatmul.bf16.vlgmr.msra.gmra.mxu0 %v2018_v36  ;;  %3090 = vset.pattern.permute.xlu1 %v3151_v34 }
 0x337   :  { %v1967_v28 = vpop.f32.mrf.mxu3  ;;  %3091 = vset.pattern.permute.xlu2 %v3151_v34 }
 0x338   :  { %v1968_v0 = vadd.f32 %v1967_v28, %v1919_v23 }
 0x33a   :  { %v2004_v46 = vmax.f32 %v1968_v0, 0.0 }
 0x33c   :  { %v1935_v24 = vpop.f32.mrf.mxu1 }
 0x33d   :  { %v1936_v11 = vadd.f32 %v4212_v63, %v1935_v24 }
 0x33f   :  { %v1969_v39 = vpop.f32.mrf.mxu3 }
 0x340   :  { %v1970_v22 = vadd.f32 %v1969_v39, %v1921_v29 }
 0x342   :  { %v2005_v43 = vmax.f32 %v1970_v22, 0.0 }
 0x344   :  { %v2019_v9 = vpack.c.bf16 %v2005_v43, %v2004_v46  ;;  %v1938_v52 = vpop.f32.mrf.mxu1 }
 0x345   :  { %v1939_v20 = vadd.f32 %v4212_v63, %v1938_v52 }
 0x346   :  { %2107 = vmatmul.bf16.gmra.mxu0 %v2019_v9 }
 0x347   :  { %v1972_v15 = vpop.f32.mrf.mxu3 }
 0x348   :  { %v1973_v7 = vadd.f32 %v1972_v15, %v1924_v4  ;;  %v4233_v15 = vld [vmem:[%s4266_s6] ss:$0 sm:$0xff] }
 0x34a   :  { %v2006_v5 = vmax.f32 %v1973_v7, 0.0 }
 0x34c   :  { %v1940_v51 = vpop.f32.mrf.mxu1 }
 0x34d   :  { %v1941_v61 = vadd.f32 %v4212_v63, %v1940_v51  ;;  %v2167_v51 = vld [vmem:[#allocation4 + $0x40] sm:$0xff] }
 0x34f   :  { %v1974_v19 = vpop.f32.mrf.mxu3 }
 0x350   :  { %v1975_v12 = vadd.f32 %v1974_v19, %v1926_v8 }
 0x352   :  { %v2007_v3 = vmax.f32 %v1975_v12, 0.0 }
 0x354   :  { %v2020_v1 = vpack.c.bf16 %v2007_v3, %v2006_v5  ;;  %v1943_v26 = vpop.f32.mrf.mxu1 }
 0x355   :  { %v1944_v56 = vadd.f32 %v4212_v63, %v1943_v26 }
 0x356   :  { %2112 = vmatmul.bf16.gmra.mxu0 %v2020_v1  ;;  %v2159_v1 = vld [vmem:[#allocation4] sm:$0xff] }
 0x357   :  { %v1977_v32 = vpop.f32.mrf.mxu3  ;;  %2210 = vperm.xlu1 %3090, %v2159_v1  }
 0x358   :  { %v1978_v53 = vadd.f32 %v1977_v32, %v1929_v16 }
 0x35a   :  { %v2008_v59 = vmax.f32 %v1978_v53, 0.0  ;;  %v2160_v53 = vld [vmem:[#allocation4 + $0x8] sm:$0xff] }
 0x35c   :  { %v1945_v45 = vpop.f32.mrf.mxu1 }
 0x35d   :  { %v1946_v25 = vadd.f32 %v4212_v63, %v1945_v45 }
 0x35f   :  { %v1979_v57 = vpop.f32.mrf.mxu3  ;;  %2215 = vperm.xlu1 %3090, %v2160_v53  }
 0x360   :  { %v1980_v18 = vadd.f32 %v1979_v57, %v1931_v50 }
 0x362   :  { %v2009_v58 = vmax.f32 %v1980_v18, 0.0 }
 0x364   :  { %v2021_v10 = vpack.c.bf16 %v2009_v58, %v2008_v59  ;;  %v1948_v35 = vpop.f32.mrf.mxu1 }
 0x365   :  { %v1949_v29 = vadd.f32 %v4212_v63, %v1948_v35 }
 0x366   :  { %2117 = vmatmul.bf16.gmra.mxu0 %v2021_v10 }
 0x367   :  { %v1982_v60 = vpop.f32.mrf.mxu3 }
 0x368   :  { %v1983_v33 = vadd.f32 %v1982_v60, %v1934_v55  ;;  %v2163_v60 = vld [vmem:[#allocation4 + $0x20] sm:$0xff] }
 0x369   :  { %2230 = vperm.xlu1 %3090, %v2163_v60  }
 0x36a   :  { %v2010_v62 = vmax.f32 %v1983_v33, 0.0  ;;  %v2165_v33 = vld [vmem:[#allocation4 + $0x30] sm:$0xff] }
 0x36c   :  { %v1950_v23 = vpop.f32.mrf.mxu1 }
 0x36d   :  { %v1951_v0 = vadd.f32 %v4212_v63, %v1950_v23  ;;  %v2172_v23 = vld [vmem:[#allocation4 + $0x68] sm:$0xff] }
 0x36f   :  { %v1984_v48 = vpop.f32.mrf.mxu3 }
 0x370   :  { %v1985_v42 = vadd.f32 %v1984_v48, %v1936_v11  ;;  %v2161_v48 = vld [vmem:[#allocation4 + $0x10] sm:$0xff] }
 0x371   :  { %2240 = vperm.xlu1 %3090, %v2165_v33   ;;  %2220 = vperm.xlu2 %3091, %v2161_v48  }
 0x372   :  { %v2011_v27 = vmax.f32 %v1985_v42, 0.0 }
 0x374   :  { %v2022_v30 = vpack.c.bf16 %v2011_v27, %v2010_v62 }
 0x376   :  { %2122 = vmatmul.bf16.gmra.mxu0 %v2022_v30  ;;  %v2162_v30 = vld [vmem:[#allocation4 + $0x18] sm:$0xff] }
 0x377   :  { %v1987_v38 = vpop.f32.mrf.mxu3 }
 0x378   :  { %v1988_v17 = vadd.f32 %v1987_v38, %v1939_v20 }
 0x379   :  { %2250 = vperm.xlu1 %3090, %v2167_v51   ;;  %2225 = vperm.xlu2 %3091, %v2162_v30  }
 0x37a   :  { %v2012_v31 = vmax.f32 %v1988_v17, 0.0  ;;  %v2164_v17 = vld [vmem:[#allocation4 + $0x28] sm:$0xff] }
 0x37f   :  { %v1989_v44 = vpop.f32.mrf.mxu3 }
 0x380   :  { %v1990_v21 = vadd.f32 %v1989_v44, %v1941_v61  ;;  %v2169_v61 = vld [vmem:[#allocation4 + $0x50] sm:$0xff] }
 0x381   :  { %2260 = vperm.xlu1 %3090, %v2169_v61   ;;  %2235 = vperm.xlu2 %3091, %v2164_v17  }
 0x382   :  { %v2013_v14 = vmax.f32 %v1990_v21, 0.0 }
 0x384   :  { %v2023_v13 = vpack.c.bf16 %v2013_v14, %v2012_v31  ;;  %v2171_v14 = vld [vmem:[#allocation4 + $0x60] sm:$0xff] }
 0x386   :  { %2127 = vmatmul.bf16.gmra.mxu0 %v2023_v13  ;;  %v2166_v13 = vld [vmem:[#allocation4 + $0x38] sm:$0xff] }
 0x387   :  { %v1992_v49 = vpop.f32.mrf.mxu3 }
 0x388   :  { %v1993_v47 = vadd.f32 %v1992_v49, %v1944_v56 }
 0x389   :  { %2270 = vperm.xlu1 %3090, %v2171_v14   ;;  %2245 = vperm.xlu2 %3091, %v2166_v13  }
 0x38a   :  { %v2014_v6 = vmax.f32 %v1993_v47, 0.0  ;;  %v2168_v47 = vld [vmem:[#allocation4 + $0x48] sm:$0xff] }
 0x38f   :  { %v1994_v41 = vpop.f32.mrf.mxu3 }
 0x390   :  { %v1995_v54 = vadd.f32 %v1994_v41, %v1946_v25  ;;  %v2173_v25 = vld [vmem:[#allocation4 + $0x70] sm:$0xff] }
 0x391   :  { %2280 = vperm.xlu1 %3090, %v2173_v25   ;;  %2255 = vperm.xlu2 %3091, %v2168_v47  }
 0x392   :  { %v2015_v36 = vmax.f32 %v1995_v54, 0.0 }
 0x394   :  { %v2024_v40 = vpack.c.bf16 %v2015_v36, %v2014_v6  ;;  %v2170_v6 = vld [vmem:[#allocation4 + $0x58] sm:$0xff] }
 0x396   :  { %2132 = vmatmul.bf16.gmra.mxu0 %v2024_v40 }
 0x397   :  { %v1997_v28 = vpop.f32.mrf.mxu3 }
 0x398   :  { %v1998_v39 = vadd.f32 %v1997_v28, %v1949_v29 }
 0x399   :  { %2265 = vperm.xlu2 %3091, %v2170_v6  }
 0x39a   :  { %v2016_v46 = vmax.f32 %v1998_v39, 0.0 }
 0x39f   :  { %v1999_v22 = vpop.f32.mrf.mxu3 }
 0x3a0   :  { %v2000_v37 = vadd.f32 %v1999_v22, %v1951_v0  ;;  %v2174_v22 = vld [vmem:[#allocation4 + $0x78] sm:$0xff] }
 0x3a1   :  { %2275 = vperm.xlu2 %3091, %v2172_v23  }
 0x3a2   :  { %v2017_v43 = vmax.f32 %v2000_v37, 0.0 }
 0x3a4   :  { %v2025_v9 = vpack.c.bf16 %v2017_v43, %v2016_v46 }
 0x3a6   :  { %2137 = vmatmul.bf16.gmra.mxu0 %v2025_v9 }
 0x3a9   :  { %2285 = vperm.xlu2 %3091, %v2174_v22  }
 0x3b3   :  { %v2103_v2 = vpop.f32.mrf.mxu0 }
 0x3b4   :  { %v2104_v4 = vadd.f32 %v4233_v15, %v2103_v2 }
 0x3b6   :  { %v2143_v8 = vmax.f32 %v2104_v4, 0.0 }
 0x3b8   :  { %2176 = vxpose.xlu0.b32.start [1/16] %v2143_v8, 128 }
 0x3bb   :  { %v2105_v7 = vpop.f32.mrf.mxu0 }
 0x3bc   :  { %v2106_v63 = vadd.f32 %v4233_v15, %v2105_v7 }
 0x3be   :  { %v2144_v19 = vmax.f32 %v2106_v63, 0.0 }
 0x3c0   :  { %2177 = vxpose.xlu0.b32.cont [2/16] %v2144_v19, 128 }
 0x3c3   :  { %v2108_v12 = vpop.f32.mrf.mxu0 }
 0x3c4   :  { %v2109_v5 = vadd.f32 %v4233_v15, %v2108_v12 }
 0x3c6   :  { %v2145_v3 = vmax.f32 %v2109_v5, 0.0 }
 0x3c8   :  { %2178 = vxpose.xlu0.b32.cont [3/16] %v2145_v3, 128 }
 0x3c9   :  { %v2211_v8 = vpop.permute.xlu1 %2210 }
 0x3cb   :  { %v2110_v32 = vpop.f32.mrf.mxu0  ;;  %v2221_v1 = vpop.permute.xlu2 %2220 }
 0x3cc   :  { %v2111_v16 = vadd.f32 %v4233_v15, %v2110_v32 }
 0x3ce   :  { %v2146_v50 = vmax.f32 %v2111_v16, 0.0 }
 0x3d0   :  { %2179 = vxpose.xlu0.b32.cont [4/16] %v2146_v50, 128 }
 0x3d1   :  { %v2216_v63 = vpop.permute.xlu1 %2215 }
 0x3d3   :  { %v2113_v24 = vpop.f32.mrf.mxu0  ;;  %v2226_v53 = vpop.permute.xlu2 %2225 }
 0x3d4   :  { %v2114_v57 = vadd.f32 %v4233_v15, %v2113_v24 }
 0x3d6   :  { %v2147_v18 = vmax.f32 %v2114_v57, 0.0 }
 0x3d8   :  { %2180 = vxpose.xlu0.b32.cont [5/16] %v2147_v18, 128 }
 0x3db   :  { %v2115_v59 = vpop.f32.mrf.mxu0  ;;  %v2236_v33 = vpop.permute.xlu2 %2235 }
 0x3dc   :  { %v2116_v58 = vadd.f32 %v4233_v15, %v2115_v59  ;;  %v2231_v59 = vpop.permute.xlu1 %2230 }
 0x3de   :  { %v2148_v10 = vmax.f32 %v2116_v58, 0.0 }
 0x3e0   :  { %2181 = vxpose.xlu0.b32.cont [6/16] %v2148_v10, 128 }
 0x3e3   :  { %v2118_v52 = vpop.f32.mrf.mxu0 }
 0x3e4   :  { %v2119_v55 = vadd.f32 %v4233_v15, %v2118_v52 }
 0x3e6   :  { %v2149_v11 = vmax.f32 %v2119_v55, 0.0 }
 0x3e8   :  { %2182 = vxpose.xlu0.b32.cont [7/16] %v2149_v11, 128 }
 0x3eb   :  { %v2120_v42 = vpop.f32.mrf.mxu0 }
 0x3ec   :  { %v2121_v62 = vadd.f32 %v4233_v15, %v2120_v42  ;;  %v2241_v42 = vpop.permute.xlu1 %2240 }
 0x3ee   :  { %v2150_v27 = vmax.f32 %v2121_v62, 0.0  ;;  %v2246_v62 = vpop.permute.xlu2 %2245 }
 0x3f0   :  { %2183 = vxpose.xlu0.b32.cont [8/16] %v2150_v27, 128 }
 0x3f3   :  { %v2123_v38 = vpop.f32.mrf.mxu0 }
 0x3f4   :  { %v2124_v20 = vadd.f32 %v4233_v15, %v2123_v38  ;;  %v2251_v51 = vpop.permute.xlu1 %2250 }
 0x3f6   :  { %v2151_v26 = vmax.f32 %v2124_v20, 0.0  ;;  %v2256_v38 = vpop.permute.xlu2 %2255 }
 0x3f8   :  { %2184 = vxpose.xlu0.b32.cont [9/16] %v2151_v26, 128 }
 0x3fb   :  { %v2125_v44 = vpop.f32.mrf.mxu0 }
 0x3fc   :  { %v2126_v21 = vadd.f32 %v4233_v15, %v2125_v44  ;;  %v2261_v20 = vpop.permute.xlu1 %2260 }
 0x3fe   :  { %v2152_v31 = vmax.f32 %v2126_v21, 0.0  ;;  %v2266_v17 = vpop.permute.xlu2 %2265 }
 0x400   :  { %2185 = vxpose.xlu0.b32.cont [10/16] %v2152_v31, 128 }
 0x403   :  { %v2128_v45 = vpop.f32.mrf.mxu0 }
 0x404   :  { %v2129_v49 = vadd.f32 %v4233_v15, %v2128_v45 }
 0x406   :  { %v2153_v56 = vmax.f32 %v2129_v49, 0.0 }
 0x408   :  { %2186 = vxpose.xlu0.b32.cont [11/16] %v2153_v56, 128 }
 0x40b   :  { %v2130_v41 = vpop.f32.mrf.mxu0 }
 0x40c   :  { %v2131_v54 = vadd.f32 %v4233_v15, %v2130_v41  ;;  %v2276_v41 = vpop.permute.xlu2 %2275 }
 0x40e   :  { %v2154_v35 = vmax.f32 %v2131_v54, 0.0 }
 0x410   :  { %2187 = vxpose.xlu0.b32.cont [12/16] %v2154_v35, 128 }
 0x413   :  { %v2133_v36 = vpop.f32.mrf.mxu0 }
 0x414   :  { %v2134_v40 = vadd.f32 %v4233_v15, %v2133_v36 }
 0x416   :  { %v2155_v28 = vmax.f32 %v2134_v40, 0.0 }
 0x418   :  { %2188 = vxpose.xlu0.b32.cont [13/16] %v2155_v28, 128 }
 0x41b   :  { %v2135_v29 = vpop.f32.mrf.mxu0 }
 0x41c   :  { %v2136_v0 = vadd.f32 %v4233_v15, %v2135_v29 }
 0x41e   :  { %v2156_v39 = vmax.f32 %v2136_v0, 0.0 }
 0x420   :  { %2189 = vxpose.xlu0.b32.cont [14/16] %v2156_v39, 128 }
 0x423   :  { %v2138_v37 = vpop.f32.mrf.mxu0 }
 0x424   :  { %v2139_v46 = vadd.f32 %v4233_v15, %v2138_v37  ;;  %v2286_v37 = vpop.permute.xlu2 %2285 }
 0x426   :  { %v2157_v43 = vmax.f32 %v2139_v46, 0.0 }
 0x428   :  { %2190 = vxpose.xlu0.b32.cont [15/16] %v2157_v43, 128 }
 0x42b   :  { %v2140_v9 = vpop.f32.mrf.mxu0 }
 0x42c   :  { %v2141_v2 = vadd.f32 %v4233_v15, %v2140_v9 }
 0x42e   :  { %v2158_v4 = vmax.f32 %v2141_v2, 0.0 }
 0x430   :  { %2191 = vxpose.xlu0.b32.end [16/16] %v2158_v4, 128 }
 0x45c   :  { %v2192_v7 = vpop.trf.xlu0 }
 0x45d   :  { %v2288_v12 = vmul.f32 %v2211_v8, %v2192_v7 }
 0x464   :  { %v2193_v19 = vpop.trf.xlu0 }
 0x465   :  { %v2289_v5 = vmul.f32 %v2216_v63, %v2193_v19 }
 0x467   :  { %v2304_v3 = vadd.f32 %v2289_v5, %v2288_v12  ;;  %v2175_v12 = vld [vmem:[%s4268_s8] sm:$0x1] }
 0x46c   :  { %v2194_v32 = vpop.trf.xlu0 }
 0x46d   :  { %v2290_v16 = vmul.f32 %v2221_v1, %v2194_v32 }
 0x46f   :  { %v2305_v50 = vadd.f32 %v2304_v3, %v2290_v16 }
 0x474   :  { %v2195_v24 = vpop.trf.xlu0 }
 0x475   :  { %v2291_v57 = vmul.f32 %v2226_v53, %v2195_v24 }
 0x477   :  { %v2306_v18 = vadd.f32 %v2305_v50, %v2291_v57 }
 0x47c   :  { %v2196_v58 = vpop.trf.xlu0 }
 0x47d   :  { %v2292_v15 = vmul.f32 %v2231_v59, %v2196_v58 }
 0x47f   :  { %v2307_v10 = vadd.f32 %v2306_v18, %v2292_v15 }
 0x484   :  { %v2197_v60 = vpop.trf.xlu0 }
 0x485   :  { %v2293_v61 = vmul.f32 %v2236_v33, %v2197_v60 }
 0x487   :  { %v2308_v21 = vadd.f32 %v2307_v10, %v2293_v61 }
 0x48c   :  { %v2198_v52 = vpop.trf.xlu0 }
 0x48d   :  { %v2294_v44 = vmul.f32 %v2241_v42, %v2198_v52 }
 0x48f   :  { %v2309_v13 = vadd.f32 %v2308_v21, %v2294_v44 }
 0x494   :  { %v2199_v55 = vpop.trf.xlu0 }
 0x495   :  { %v2295_v31 = vmul.f32 %v2246_v62, %v2199_v55 }
 0x497   :  { %3092 = vset.pattern.permute.xlu0 %v3151_v34  ;;  %v2271_v34 = vpop.permute.xlu1 %2270  ;;  %v2310_v49 = vadd.f32 %v2309_v13, %v2295_v31 }
 0x49c   :  { %v2200_v11 = vpop.trf.xlu0 }
 0x49d   :  { %v2296_v45 = vmul.f32 %v2251_v51, %v2200_v11 }
 0x49f   :  { %v2311_v25 = vadd.f32 %v2310_v49, %v2296_v45  ;;  %v2281_v29 = vpop.permute.xlu1 %2280 }
 0x4a4   :  { %v2201_v48 = vpop.trf.xlu0 }
 0x4a5   :  { %v2297_v56 = vmul.f32 %v2256_v38, %v2201_v48 }
 0x4a7   :  { %v2312_v54 = vadd.f32 %v2311_v25, %v2297_v56 }
 0x4ac   :  { %v2202_v27 = vpop.trf.xlu0 }
 0x4ad   :  { %v2298_v47 = vmul.f32 %v2261_v20, %v2202_v27 }
 0x4af   :  { %v2313_v36 = vadd.f32 %v2312_v54, %v2298_v47 }
 0x4b4   :  { %v2203_v30 = vpop.trf.xlu0 }
 0x4b5   :  { %v2299_v35 = vmul.f32 %v2266_v17, %v2203_v30 }
 0x4b7   :  { %v2314_v28 = vadd.f32 %v2313_v36, %v2299_v35 }
 0x4bc   :  { %v2204_v26 = vpop.trf.xlu0 }
 0x4bd   :  { %v2300_v40 = vmul.f32 %v2271_v34, %v2204_v26 }
 0x4bf   :  { %v2315_v0 = vadd.f32 %v2314_v28, %v2300_v40 }
 0x4c4   :  { %v2205_v14 = vpop.trf.xlu0 }
 0x4c5   :  { %v2301_v23 = vmul.f32 %v2276_v41, %v2205_v14 }
 0x4c7   :  { %v2316_v22 = vadd.f32 %v2315_v0, %v2301_v23 }
 0x4cc   :  { %v2206_v6 = vpop.trf.xlu0 }
 0x4cd   :  { %v2302_v39 = vmul.f32 %v2281_v29, %v2206_v6 }
 0x4cf   :  { %v2317_v43 = vadd.f32 %v2316_v22, %v2302_v39 }
 0x4d4   :  { %v2207_v46 = vpop.trf.xlu0 }
 0x4d5   :  { %v2303_v9 = vmul.f32 %v2286_v37, %v2207_v46 }
 0x4d7   :  { %v2318_v2 = vadd.f32 %v2317_v43, %v2303_v9 }
 0x4d9   :  { %v2319_v4 = vrot.slane %v2318_v2, 4 }
 0x4db   :  { %v2320_v8 = vadd.f32 %v2319_v4, %v2318_v2 }
 0x4dd   :  { %v2321_v7 = vrot.slane %v2320_v8, 2 }
 0x4df   :  { %v2322_v63 = vadd.f32 %v2321_v7, %v2320_v8 }
 0x4e1   :  { %v2323_v19 = vrot.slane %v2322_v63, 1 }
 0x4e3   :  { %v2324_v5 = vadd.f32 %v2323_v19, %v2322_v63 }
 0x4e5   :  { %v2325_v3 = vadd.f32 %v2324_v5, %v2175_v12 }
 0x4e7   :  { %2326 = vst [vmem:[%s4269_s9] sm:$0x1] %v2325_v3 }
 0x4e8   :  { %2331 = vsyncpa [#allocation3], 1 }
 0x4e9   :  { %2332 = vsyncpa [#allocation5], 1 }

</bundles_post_ra>
